<compile_context>
chip_gen: v5e
topology: v5e:2x2
jax: 0.10.0
libtpu: 0.0.40
codegen_flags: <defaults>
</compile_context>

<pallas_src>
import functools

import jax
import jax.numpy as jnp
from jax.experimental import pallas as pl
from jax.experimental.pallas import tpu as pltpu


def affine_coupling_kernel(
    x_ref,
    w1m_ref, b1_ref, w2_ref, b2_ref,
    w3s_ref, b3s_ref, w3t_ref, b3t_ref,
    z_ref, logdet_ref,
):
    x = x_ref[...].astype(jnp.float32)          # (TILE_B, Dp) f32 for epilogue
    xb = x_ref[...].astype(jnp.bfloat16)        # bf16 MXU operand

    # Conditioner MLP: bf16 operands, f32 MXU accumulation.  ReLUs narrow the
    # intermediates back to bf16 immediately to keep vreg / VMEM pressure low.
    h1 = jnp.dot(xb, w1m_ref[...], preferred_element_type=jnp.float32) + b1_ref[...]
    h1 = jnp.maximum(h1, 0.0).astype(jnp.bfloat16)
    h2 = jnp.dot(h1, w2_ref[...], preferred_element_type=jnp.float32) + b2_ref[...]
    h2 = jnp.maximum(h2, 0.0).astype(jnp.bfloat16)

    # s/t heads.  The binary mask is folded into w3s/b3s/w3t/b3t, so s == 0
    # and t == 0 at pass-through features: no select needed in the combine.
    s = jnp.tanh(jnp.dot(h2, w3s_ref[...], preferred_element_type=jnp.float32)
                 + b3s_ref[...]) * 0.5
    t = (jnp.dot(h2, w3t_ref[...], preferred_element_type=jnp.float32)
         + b3t_ref[...])

    z_ref[...] = (x * jnp.exp(s) + t).astype(z_ref.dtype)
    logdet_ref[...] = jnp.sum(s, axis=1, keepdims=True).astype(logdet_ref.dtype)


def _bspec(shape, index_map, buffer_count=None):
    """BlockSpec helper; gracefully drops pipeline_mode on older jax."""
    if buffer_count is None:
        return pl.BlockSpec(shape, index_map)
    try:
        return pl.BlockSpec(shape, index_map, pipeline_mode=pl.Buffered(buffer_count))
    except TypeError:
        return pl.BlockSpec(shape, index_map)


def _round_up(n, m):
    return ((n + m - 1) // m) * m


def _tpu_generation_info():
    """(device_kind_lower, vmem_capacity_bytes) with safe fallbacks."""
    kind = ""
    capacity = 128 * 1024 * 1024
    try:
        kind = jax.devices()[0].device_kind.lower()
    except Exception:
        pass
    try:
        capacity = int(pltpu.get_tpu_info().vmem_capacity_bytes)
    except Exception:
        pass
    if "v7" in kind:  # v7x has 64 MiB / TC regardless of what the query said
        capacity = min(capacity, 64 * 1024 * 1024)
    return kind, capacity


@functools.partial(
    jax.jit,
    static_argnames=("tile_b", "d_pad", "h_pad", "vmem_limit", "buffered_weights"),
)
def _affine_coupling_fwd(x, mask, w1, b1, w2, b2, w3, b3, *,
                         tile_b, d_pad, h_pad, vmem_limit, buffered_weights):
    B, D = x.shape
    H = w1.shape[1]
    f32 = jnp.float32

    mask = mask.astype(f32).reshape(1, D)
    inv = 1.0 - mask                                   # (1, D)

    # --- wrapper-side prep (layout plumbing, not hot-path compute) ----------
    # Fold the input mask into w1 (x*mask @ w1 == x @ (mask^T * w1)) and the
    # output mask into the s/t heads, then zero-pad everything to
    # MXU/lane-friendly (d_pad, h_pad).  Bias pads are zero, so the padding is
    # exact (ReLU(0)=0, tanh(0)=0).
    w1m = mask.reshape(D, 1) * w1.astype(f32)
    w3s = w3[:, :D].astype(f32) * inv
    w3t = w3[:, D:].astype(f32) * inv
    b3s = b3.reshape(1, -1)[:, :D].astype(f32) * inv
    b3t = b3.reshape(1, -1)[:, D:].astype(f32) * inv

    def pad2(a, rows, cols):
        return jnp.zeros((rows, cols), a.dtype).at[: a.shape[0], : a.shape[1]].set(a)

    w1p = pad2(w1m, d_pad, h_pad).astype(jnp.bfloat16)
    w2p = pad2(w2.astype(f32), h_pad, h_pad).astype(jnp.bfloat16)
    w3sp = pad2(w3s, h_pad, d_pad).astype(jnp.bfloat16)
    w3tp = pad2(w3t, h_pad, d_pad).astype(jnp.bfloat16)
    b1p = pad2(b1.reshape(1, -1).astype(f32), 1, h_pad)
    b2p = pad2(b2.reshape(1, -1).astype(f32), 1, h_pad)
    b3sp = pad2(b3s, 1, d_pad)
    b3tp = pad2(b3t, 1, d_pad)

    # --- batch tiling: aim for >= ~4 grid steps so the "parallel" batch axis
    # can be sharded across v7x's two TensorCores and the pipeline overlaps.
    B8 = _round_up(B, 8)
    step_target = max(8, _round_up((B8 + 3) // 4, 8))
    tile = max(8, min(tile_b, step_target))
    b_pad = _round_up(B, tile)

    x_pad = jnp.zeros((b_pad, d_pad), x.dtype).at[:B, :D].set(x)

    grid = (b_pad // tile,)
    wbuf = 1 if buffered_weights else None   # constant-index weights: single buffer
    const = lambda shape: _bspec(shape, lambda i: (0, 0), buffer_count=wbuf)

    z, logdet = pl.pallas_call(
        affine_coupling_kernel,
        out_shape=(
            jax.ShapeDtypeStruct((b_pad, d_pad), x.dtype),
            jax.ShapeDtypeStruct((b_pad, 1), jnp.float32),
        ),
        grid=grid,
        in_specs=[
            _bspec((tile, d_pad), lambda i: (i, 0)),   # x (double-buffered default)
            const((d_pad, h_pad)),                     # w1 (mask folded, bf16)
            const((1, h_pad)),                         # b1
            const((h_pad, h_pad)),                     # w2 (bf16)
            const((1, h_pad)),                         # b2
            const((h_pad, d_pad)),                     # w3 s-head (mask folded, bf16)
            const((1, d_pad)),                         # b3 s-head
            const((h_pad, d_pad)),                     # w3 t-head (mask folded, bf16)
            const((1, d_pad)),                         # b3 t-head
        ],
        out_specs=(
            _bspec((tile, d_pad), lambda i: (i, 0)),           # z
            pl.BlockSpec((tile, 1), lambda i: (i, 0)),          # log_det
        ),
        compiler_params=pltpu.CompilerParams(
            dimension_semantics=("parallel",),   # shard batch over TCs (v7x)
            vmem_limit_bytes=vmem_limit,
        ),
    )(x_pad, w1p, b1p, w2p, b2p, w3sp, b3sp, w3tp, b3tp)

    return z[:B, :D], logdet[:B, 0]


def affine_coupling_forward(x, mask, params, *, tile_b=None):
    """AffineCouplingLayer forward pass. Returns (z, log_det)."""
    mask = jnp.asarray(mask, jnp.float32).reshape(1, -1)
    # Mask folding into w1 / w3 heads is exact only for a strictly binary mask.
    if not bool(jnp.all((mask == 0.0) | (mask == 1.0))):
        raise ValueError("AffineCouplingLayer mask must be strictly binary {0,1}.")

    w1, b1, w2, b2, w3, b3 = params
    D = x.shape[1]

    kind, capacity = _tpu_generation_info()
    # Lane/MXU padding multiple: 128 on v5 (4x128^2 MXU), 256 on v6e/v7x (2x256^2).
    pad = 128 if "v5" in kind else 256
    d_pad = max(_round_up(D, pad), 128)
    h_pad = max(_round_up(w1.shape[1], pad), 128)

    if tile_b is None:
        # 64 MiB/TC (v7x): smaller tiles; 128 MiB (v5e/v6e): go big.
        tile_b = 512 if capacity <= 64 * 1024 * 1024 else 1024
    # Leave headroom below physical VMEM; still well above the scoped defaults.
    vmem_limit = max(32 << 20, min(100 << 20, int(0.70 * capacity)))

    args = (x, mask, w1, b1, w2, b2, w3, b3)
    kw = dict(tile_b=int(tile_b), d_pad=int(d_pad), h_pad=int(h_pad),
              vmem_limit=int(vmem_limit))
    try:
        return _affine_coupling_fwd(*args, buffered_weights=True, **kw)
    except Exception:
        # Fallback for jax versions where Buffered(1)/pipeline_mode is rejected.
        return _affine_coupling_fwd(*args, buffered_weights=False, **kw)


def make_params(key, dim, hidden_dim):
    """Deterministic synthetic parameters (weights stored as [in, out])."""
    k1, k2, k3, k4, k5, k6 = jax.random.split(key, 6)
    scale = 0.1
    w1 = scale * jax.random.normal(k1, (dim, hidden_dim), jnp.float32)
    b1 = scale * jax.random.normal(k2, (1, hidden_dim), jnp.float32)
    w2 = scale * jax.random.normal(k3, (hidden_dim, hidden_dim), jnp.float32)
    b2 = scale * jax.random.normal(k4, (1, hidden_dim), jnp.float32)
    w3 = scale * jax.random.normal(k5, (hidden_dim, dim * 2), jnp.float32)
    b3 = scale * jax.random.normal(k6, (1, dim * 2), jnp.float32)
    return (w1, b1, w2, b2, w3, b3)


def make_mask(dim, mask_type="alternate"):
    mask = jnp.zeros((dim,), jnp.float32)
    if mask_type == "alternate":
        mask = mask.at[::2].set(1.0)
    else:
        mask = mask.at[: dim // 2].set(1.0)
    return mask.reshape(1, -1)


def reference_forward(x, mask, params):
    """Plain-JAX f32 reference, mirrors the PyTorch forward exactly."""
    w1, b1, w2, b2, w3, b3 = params
    x_masked = x * mask
    h1 = jnp.maximum(x_masked @ w1 + b1, 0.0)
    h2 = jnp.maximum(h1 @ w2 + b2, 0.0)
    nn_out = h2 @ w3 + b3
    D = x.shape[1]
    s = jnp.tanh(nn_out[:, :D]) * 0.5
    t = nn_out[:, D:]
    inv = 1.0 - mask
    z = x_masked + (x * inv * jnp.exp(s) + t) * inv
    log_det = jnp.sum(s * inv, axis=1)
    return z, log_det


if __name__ == "__main__":
    # Small test shapes; D/H are zero-padded to full MXU width inside the
    # wrapper, so the kernel path is identical to production-sized runs.
    batch, dim, hidden_dim = 8, 16, 32
    key = jax.random.PRNGKey(0)
    kx, kp = jax.random.split(key)

    x = jax.random.normal(kx, (batch, dim), jnp.float32)
    mask = make_mask(dim, "alternate")
    params = make_params(kp, dim, hidden_dim)

    z, log_det = affine_coupling_forward(x, mask, params)
    jax.block_until_ready((z, log_det))

    # bf16 matmul operands (f32 accumulate) => relaxed tolerance vs f32 ref.
    z_ref, ld_ref = reference_forward(x, mask, params)
    assert z.shape == z_ref.shape and log_det.shape == ld_ref.shape
    assert jnp.allclose(z, z_ref, atol=2e-2, rtol=2e-2), (
        float(jnp.max(jnp.abs(z - z_ref))))
    assert jnp.allclose(log_det, ld_ref, atol=2e-2, rtol=2e-2), (
        float(jnp.max(jnp.abs(log_det - ld_ref))))

    print("KERNEL_OK")
</pallas_src>

<mosaic_0001>
module attributes {stable_mosaic.version = 11 : i64} {
  func.func @affine_coupling_kernel(%arg0: i32, %arg1: memref<8x256xf32, #tpu.memory_space<vmem>>, %arg2: memref<256x256xbf16, #tpu.memory_space<vmem>>, %arg3: memref<1x256xf32, #tpu.memory_space<vmem>>, %arg4: memref<256x256xbf16, #tpu.memory_space<vmem>>, %arg5: memref<1x256xf32, #tpu.memory_space<vmem>>, %arg6: memref<256x256xbf16, #tpu.memory_space<vmem>>, %arg7: memref<1x256xf32, #tpu.memory_space<vmem>>, %arg8: memref<256x256xbf16, #tpu.memory_space<vmem>>, %arg9: memref<1x256xf32, #tpu.memory_space<vmem>>, %arg10: memref<8x256xf32, #tpu.memory_space<vmem>>, %arg11: memref<8x1xf32, #tpu.memory_space<vmem>>) attributes {dimension_semantics = [#tpu.dimension_semantics<parallel>], iteration_bounds = array<i64: 1>, scalar_prefetch = 0 : i64, scratch_operands = 0 : i64, tpu.core_type = #tpu.core_type<tc>, window_params = [{transform_indices = @transform_0, window_bounds = array<i64: 8, 256>}, {pipeline_mode = #tpu.pipeline_mode<synchronous>, transform_indices = @transform_1, window_bounds = array<i64: 256, 256>}, {pipeline_mode = #tpu.pipeline_mode<synchronous>, transform_indices = @transform_2, window_bounds = array<i64: 1, 256>}, {pipeline_mode = #tpu.pipeline_mode<synchronous>, transform_indices = @transform_3, window_bounds = array<i64: 256, 256>}, {pipeline_mode = #tpu.pipeline_mode<synchronous>, transform_indices = @transform_4, window_bounds = array<i64: 1, 256>}, {pipeline_mode = #tpu.pipeline_mode<synchronous>, transform_indices = @transform_5, window_bounds = array<i64: 256, 256>}, {pipeline_mode = #tpu.pipeline_mode<synchronous>, transform_indices = @transform_6, window_bounds = array<i64: 1, 256>}, {pipeline_mode = #tpu.pipeline_mode<synchronous>, transform_indices = @transform_7, window_bounds = array<i64: 256, 256>}, {pipeline_mode = #tpu.pipeline_mode<synchronous>, transform_indices = @transform_8, window_bounds = array<i64: 1, 256>}, {transform_indices = @transform_9, window_bounds = array<i64: 8, 256>}, {transform_indices = @transform_10, window_bounds = array<i64: 8, 1>}]} {
    %c0 = arith.constant 0 : index
    %c0_0 = arith.constant 0 : index
    %0 = vector.load %arg1[%c0, %c0_0] : memref<8x256xf32, #tpu.memory_space<vmem>>, vector<8x256xf32>
    %c0_1 = arith.constant 0 : index
    %c0_2 = arith.constant 0 : index
    %1 = vector.load %arg1[%c0_1, %c0_2] : memref<8x256xf32, #tpu.memory_space<vmem>>, vector<8x256xf32>
    %2 = arith.truncf %1 : vector<8x256xf32> to vector<8x256xbf16>
    %c0_3 = arith.constant 0 : index
    %c0_4 = arith.constant 0 : index
    %3 = vector.load %arg2[%c0_3, %c0_4] : memref<256x256xbf16, #tpu.memory_space<vmem>>, vector<256x256xbf16>
    %cst = arith.constant dense<0.000000e+00> : vector<8x256xf32>
    %4 = tpu.matmul %2, %3, %cst {dimension_numbers = #tpu.dot_dimension_numbers<[1], [0], [0], [1], [0, 0, 1, 1], [], []>} : vector<8x256xbf16>, vector<256x256xbf16>, vector<8x256xf32> -> vector<8x256xf32>
    %c0_5 = arith.constant 0 : index
    %c0_6 = arith.constant 0 : index
    %5 = vector.load %arg3[%c0_5, %c0_6] : memref<1x256xf32, #tpu.memory_space<vmem>>, vector<1x256xf32>
    %6 = vector.broadcast %5 : vector<1x256xf32> to vector<8x256xf32>
    %7 = arith.addf %4, %6 : vector<8x256xf32>
    %cst_7 = arith.constant 0.000000e+00 : f32
    %8 = vector.broadcast %cst_7 : f32 to vector<8x256xf32>
    %9 = arith.maximumf %7, %8 : vector<8x256xf32>
    %10 = arith.truncf %9 : vector<8x256xf32> to vector<8x256xbf16>
    %c0_8 = arith.constant 0 : index
    %c0_9 = arith.constant 0 : index
    %11 = vector.load %arg4[%c0_8, %c0_9] : memref<256x256xbf16, #tpu.memory_space<vmem>>, vector<256x256xbf16>
    %cst_10 = arith.constant dense<0.000000e+00> : vector<8x256xf32>
    %12 = tpu.matmul %10, %11, %cst_10 {dimension_numbers = #tpu.dot_dimension_numbers<[1], [0], [0], [1], [0, 0, 1, 1], [], []>} : vector<8x256xbf16>, vector<256x256xbf16>, vector<8x256xf32> -> vector<8x256xf32>
    %c0_11 = arith.constant 0 : index
    %c0_12 = arith.constant 0 : index
    %13 = vector.load %arg5[%c0_11, %c0_12] : memref<1x256xf32, #tpu.memory_space<vmem>>, vector<1x256xf32>
    %14 = vector.broadcast %13 : vector<1x256xf32> to vector<8x256xf32>
    %15 = arith.addf %12, %14 : vector<8x256xf32>
    %cst_13 = arith.constant 0.000000e+00 : f32
    %16 = vector.broadcast %cst_13 : f32 to vector<8x256xf32>
    %17 = arith.maximumf %15, %16 : vector<8x256xf32>
    %18 = arith.truncf %17 : vector<8x256xf32> to vector<8x256xbf16>
    %c0_14 = arith.constant 0 : index
    %c0_15 = arith.constant 0 : index
    %19 = vector.load %arg6[%c0_14, %c0_15] : memref<256x256xbf16, #tpu.memory_space<vmem>>, vector<256x256xbf16>
    %cst_16 = arith.constant dense<0.000000e+00> : vector<8x256xf32>
    %20 = tpu.matmul %18, %19, %cst_16 {dimension_numbers = #tpu.dot_dimension_numbers<[1], [0], [0], [1], [0, 0, 1, 1], [], []>} : vector<8x256xbf16>, vector<256x256xbf16>, vector<8x256xf32> -> vector<8x256xf32>
    %c0_17 = arith.constant 0 : index
    %c0_18 = arith.constant 0 : index
    %21 = vector.load %arg7[%c0_17, %c0_18] : memref<1x256xf32, #tpu.memory_space<vmem>>, vector<1x256xf32>
    %22 = vector.broadcast %21 : vector<1x256xf32> to vector<8x256xf32>
    %23 = arith.addf %20, %22 : vector<8x256xf32>
    %24 = math.tanh %23 : vector<8x256xf32>
    %cst_19 = arith.constant 5.000000e-01 : f32
    %25 = vector.broadcast %cst_19 : f32 to vector<8x256xf32>
    %26 = arith.mulf %24, %25 : vector<8x256xf32>
    %c0_20 = arith.constant 0 : index
    %c0_21 = arith.constant 0 : index
    %27 = vector.load %arg8[%c0_20, %c0_21] : memref<256x256xbf16, #tpu.memory_space<vmem>>, vector<256x256xbf16>
    %cst_22 = arith.constant dense<0.000000e+00> : vector<8x256xf32>
    %28 = tpu.matmul %18, %27, %cst_22 {dimension_numbers = #tpu.dot_dimension_numbers<[1], [0], [0], [1], [0, 0, 1, 1], [], []>} : vector<8x256xbf16>, vector<256x256xbf16>, vector<8x256xf32> -> vector<8x256xf32>
    %c0_23 = arith.constant 0 : index
    %c0_24 = arith.constant 0 : index
    %29 = vector.load %arg9[%c0_23, %c0_24] : memref<1x256xf32, #tpu.memory_space<vmem>>, vector<1x256xf32>
    %30 = vector.broadcast %29 : vector<1x256xf32> to vector<8x256xf32>
    %31 = arith.addf %28, %30 : vector<8x256xf32>
    %32 = math.exp %26 : vector<8x256xf32>
    %33 = arith.mulf %0, %32 : vector<8x256xf32>
    %34 = arith.addf %33, %31 : vector<8x256xf32>
    %c0_25 = arith.constant 0 : index
    %c0_26 = arith.constant 0 : index
    %35 = vector.load %arg10[%c0_25, %c0_26] : memref<8x256xf32, #tpu.memory_space<vmem>>, vector<8x256xf32>
    tpu.vector_store %arg10[%c0_25, %c0_26], %34 {strides = array<i32>} : memref<8x256xf32, #tpu.memory_space<vmem>>, vector<8x256xf32>,
    %cst_27 = arith.constant dense<0.000000e+00> : vector<8xf32>
    %36 = vector.multi_reduction <add>, %26, %cst_27 [1] : vector<8x256xf32> to vector<8xf32>
    %37 = vector.shape_cast %36 : vector<8xf32> to vector<8x1xf32>
    %c0_28 = arith.constant 0 : index
    %c0_29 = arith.constant 0 : index
    %38 = vector.load %arg11[%c0_28, %c0_29] : memref<8x1xf32, #tpu.memory_space<vmem>>, vector<8x1xf32>
    tpu.vector_store %arg11[%c0_28, %c0_29], %37 {strides = array<i32>} : memref<8x1xf32, #tpu.memory_space<vmem>>, vector<8x1xf32>,
    return
  }
  func.func @transform_0(%arg0: i32) -> (i32, i32) {
    %c0_i32 = arith.constant 0 : i32
    %c0_i32_0 = arith.constant 0 : i32
    return %arg0, %c0_i32 : i32, i32
  }
  func.func @transform_1(%arg0: i32) -> (i32, i32) {
    %c0_i32 = arith.constant 0 : i32
    %c0_i32_0 = arith.constant 0 : i32
    %c0_i32_1 = arith.constant 0 : i32
    return %c0_i32, %c0_i32_0 : i32, i32
  }
  func.func @transform_2(%arg0: i32) -> (i32, i32) {
    %c0_i32 = arith.constant 0 : i32
    %c0_i32_0 = arith.constant 0 : i32
    %c0_i32_1 = arith.constant 0 : i32
    return %c0_i32, %c0_i32_0 : i32, i32
  }
  func.func @transform_3(%arg0: i32) -> (i32, i32) {
    %c0_i32 = arith.constant 0 : i32
    %c0_i32_0 = arith.constant 0 : i32
    %c0_i32_1 = arith.constant 0 : i32
    return %c0_i32, %c0_i32_0 : i32, i32
  }
  func.func @transform_4(%arg0: i32) -> (i32, i32) {
    %c0_i32 = arith.constant 0 : i32
    %c0_i32_0 = arith.constant 0 : i32
    %c0_i32_1 = arith.constant 0 : i32
    return %c0_i32, %c0_i32_0 : i32, i32
  }
  func.func @transform_5(%arg0: i32) -> (i32, i32) {
    %c0_i32 = arith.constant 0 : i32
    %c0_i32_0 = arith.constant 0 : i32
    %c0_i32_1 = arith.constant 0 : i32
    return %c0_i32, %c0_i32_0 : i32, i32
  }
  func.func @transform_6(%arg0: i32) -> (i32, i32) {
    %c0_i32 = arith.constant 0 : i32
    %c0_i32_0 = arith.constant 0 : i32
    %c0_i32_1 = arith.constant 0 : i32
    return %c0_i32, %c0_i32_0 : i32, i32
  }
  func.func @transform_7(%arg0: i32) -> (i32, i32) {
    %c0_i32 = arith.constant 0 : i32
    %c0_i32_0 = arith.constant 0 : i32
    %c0_i32_1 = arith.constant 0 : i32
    return %c0_i32, %c0_i32_0 : i32, i32
  }
  func.func @transform_8(%arg0: i32) -> (i32, i32) {
    %c0_i32 = arith.constant 0 : i32
    %c0_i32_0 = arith.constant 0 : i32
    %c0_i32_1 = arith.constant 0 : i32
    return %c0_i32, %c0_i32_0 : i32, i32
  }
  func.func @transform_9(%arg0: i32) -> (i32, i32) {
    %c0_i32 = arith.constant 0 : i32
    %c0_i32_0 = arith.constant 0 : i32
    return %arg0, %c0_i32 : i32, i32
  }
  func.func @transform_10(%arg0: i32) -> (i32, i32) {
    %c0_i32 = arith.constant 0 : i32
    %c0_i32_0 = arith.constant 0 : i32
    return %arg0, %c0_i32 : i32, i32
  }
}

module attributes {stable_mosaic.version = 11 : i64} {
  func.func @affine_coupling_kernel(%arg0: i32, %arg1: memref<8x256xf32, #tpu.memory_space<vmem>>, %arg2: memref<256x256xbf16, #tpu.memory_space<vmem>>, %arg3: memref<1x256xf32, #tpu.memory_space<vmem>>, %arg4: memref<256x256xbf16, #tpu.memory_space<vmem>>, %arg5: memref<1x256xf32, #tpu.memory_space<vmem>>, %arg6: memref<256x256xbf16, #tpu.memory_space<vmem>>, %arg7: memref<1x256xf32, #tpu.memory_space<vmem>>, %arg8: memref<256x256xbf16, #tpu.memory_space<vmem>>, %arg9: memref<1x256xf32, #tpu.memory_space<vmem>>, %arg10: memref<8x256xf32, #tpu.memory_space<vmem>>, %arg11: memref<8x1xf32, #tpu.memory_space<vmem>>) attributes {dimension_semantics = [#tpu.dimension_semantics<parallel>], iteration_bounds = array<i64: 1>, scalar_prefetch = 0 : i64, scratch_operands = 0 : i64, tpu.core_type = #tpu.core_type<tc>, window_params = [{transform_indices = @transform_0, window_bounds = array<i64: 8, 256>}, {pipeline_mode = #tpu.pipeline_mode<synchronous>, transform_indices = @transform_1, window_bounds = array<i64: 256, 256>}, {pipeline_mode = #tpu.pipeline_mode<synchronous>, transform_indices = @transform_2, window_bounds = array<i64: 1, 256>}, {pipeline_mode = #tpu.pipeline_mode<synchronous>, transform_indices = @transform_3, window_bounds = array<i64: 256, 256>}, {pipeline_mode = #tpu.pipeline_mode<synchronous>, transform_indices = @transform_4, window_bounds = array<i64: 1, 256>}, {pipeline_mode = #tpu.pipeline_mode<synchronous>, transform_indices = @transform_5, window_bounds = array<i64: 256, 256>}, {pipeline_mode = #tpu.pipeline_mode<synchronous>, transform_indices = @transform_6, window_bounds = array<i64: 1, 256>}, {pipeline_mode = #tpu.pipeline_mode<synchronous>, transform_indices = @transform_7, window_bounds = array<i64: 256, 256>}, {pipeline_mode = #tpu.pipeline_mode<synchronous>, transform_indices = @transform_8, window_bounds = array<i64: 1, 256>}, {transform_indices = @transform_9, window_bounds = array<i64: 8, 256>}, {transform_indices = @transform_10, window_bounds = array<i64: 8, 1>}]} {
    %c0 = arith.constant 0 : index
    %c0_0 = arith.constant 0 : index
    %0 = vector.load %arg1[%c0, %c0_0] : memref<8x256xf32, #tpu.memory_space<vmem>>, vector<8x256xf32>
    %c0_1 = arith.constant 0 : index
    %c0_2 = arith.constant 0 : index
    %1 = vector.load %arg1[%c0_1, %c0_2] : memref<8x256xf32, #tpu.memory_space<vmem>>, vector<8x256xf32>
    %2 = arith.truncf %1 : vector<8x256xf32> to vector<8x256xbf16>
    %c0_3 = arith.constant 0 : index
    %c0_4 = arith.constant 0 : index
    %3 = vector.load %arg2[%c0_3, %c0_4] : memref<256x256xbf16, #tpu.memory_space<vmem>>, vector<256x256xbf16>
    %cst = arith.constant dense<0.000000e+00> : vector<8x256xf32>
    %4 = tpu.matmul %2, %3, %cst {dimension_numbers = #tpu.dot_dimension_numbers<[1], [0], [0], [1], [0, 0, 1, 1], [], []>} : vector<8x256xbf16>, vector<256x256xbf16>, vector<8x256xf32> -> vector<8x256xf32>
    %c0_5 = arith.constant 0 : index
    %c0_6 = arith.constant 0 : index
    %5 = vector.load %arg3[%c0_5, %c0_6] : memref<1x256xf32, #tpu.memory_space<vmem>>, vector<1x256xf32>
    %6 = vector.broadcast %5 : vector<1x256xf32> to vector<8x256xf32>
    %7 = arith.addf %4, %6 : vector<8x256xf32>
    %cst_7 = arith.constant 0.000000e+00 : f32
    %8 = vector.broadcast %cst_7 : f32 to vector<8x256xf32>
    %9 = arith.maximumf %7, %8 : vector<8x256xf32>
    %10 = arith.truncf %9 : vector<8x256xf32> to vector<8x256xbf16>
    %c0_8 = arith.constant 0 : index
    %c0_9 = arith.constant 0 : index
    %11 = vector.load %arg4[%c0_8, %c0_9] : memref<256x256xbf16, #tpu.memory_space<vmem>>, vector<256x256xbf16>
    %cst_10 = arith.constant dense<0.000000e+00> : vector<8x256xf32>
    %12 = tpu.matmul %10, %11, %cst_10 {dimension_numbers = #tpu.dot_dimension_numbers<[1], [0], [0], [1], [0, 0, 1, 1], [], []>} : vector<8x256xbf16>, vector<256x256xbf16>, vector<8x256xf32> -> vector<8x256xf32>
    %c0_11 = arith.constant 0 : index
    %c0_12 = arith.constant 0 : index
    %13 = vector.load %arg5[%c0_11, %c0_12] : memref<1x256xf32, #tpu.memory_space<vmem>>, vector<1x256xf32>
    %14 = vector.broadcast %13 : vector<1x256xf32> to vector<8x256xf32>
    %15 = arith.addf %12, %14 : vector<8x256xf32>
    %cst_13 = arith.constant 0.000000e+00 : f32
    %16 = vector.broadcast %cst_13 : f32 to vector<8x256xf32>
    %17 = arith.maximumf %15, %16 : vector<8x256xf32>
    %18 = arith.truncf %17 : vector<8x256xf32> to vector<8x256xbf16>
    %c0_14 = arith.constant 0 : index
    %c0_15 = arith.constant 0 : index
    %19 = vector.load %arg6[%c0_14, %c0_15] : memref<256x256xbf16, #tpu.memory_space<vmem>>, vector<256x256xbf16>
    %cst_16 = arith.constant dense<0.000000e+00> : vector<8x256xf32>
    %20 = tpu.matmul %18, %19, %cst_16 {dimension_numbers = #tpu.dot_dimension_numbers<[1], [0], [0], [1], [0, 0, 1, 1], [], []>} : vector<8x256xbf16>, vector<256x256xbf16>, vector<8x256xf32> -> vector<8x256xf32>
    %c0_17 = arith.constant 0 : index
    %c0_18 = arith.constant 0 : index
    %21 = vector.load %arg7[%c0_17, %c0_18] : memref<1x256xf32, #tpu.memory_space<vmem>>, vector<1x256xf32>
    %22 = vector.broadcast %21 : vector<1x256xf32> to vector<8x256xf32>
    %23 = arith.addf %20, %22 : vector<8x256xf32>
    %24 = math.tanh %23 : vector<8x256xf32>
    %cst_19 = arith.constant 5.000000e-01 : f32
    %25 = vector.broadcast %cst_19 : f32 to vector<8x256xf32>
    %26 = arith.mulf %24, %25 : vector<8x256xf32>
    %c0_20 = arith.constant 0 : index
    %c0_21 = arith.constant 0 : index
    %27 = vector.load %arg8[%c0_20, %c0_21] : memref<256x256xbf16, #tpu.memory_space<vmem>>, vector<256x256xbf16>
    %cst_22 = arith.constant dense<0.000000e+00> : vector<8x256xf32>
    %28 = tpu.matmul %18, %27, %cst_22 {dimension_numbers = #tpu.dot_dimension_numbers<[1], [0], [0], [1], [0, 0, 1, 1], [], []>} : vector<8x256xbf16>, vector<256x256xbf16>, vector<8x256xf32> -> vector<8x256xf32>
    %c0_23 = arith.constant 0 : index
    %c0_24 = arith.constant 0 : index
    %29 = vector.load %arg9[%c0_23, %c0_24] : memref<1x256xf32, #tpu.memory_space<vmem>>, vector<1x256xf32>
    %30 = vector.broadcast %29 : vector<1x256xf32> to vector<8x256xf32>
    %31 = arith.addf %28, %30 : vector<8x256xf32>
    %32 = math.exp %26 : vector<8x256xf32>
    %33 = arith.mulf %0, %32 : vector<8x256xf32>
    %34 = arith.addf %33, %31 : vector<8x256xf32>
    %c0_25 = arith.constant 0 : index
    %c0_26 = arith.constant 0 : index
    %35 = vector.load %arg10[%c0_25, %c0_26] : memref<8x256xf32, #tpu.memory_space<vmem>>, vector<8x256xf32>
    tpu.vector_store %arg10[%c0_25, %c0_26], %34 {strides = array<i32>} : memref<8x256xf32, #tpu.memory_space<vmem>>, vector<8x256xf32>,
    %cst_27 = arith.constant dense<0.000000e+00> : vector<8xf32>
    %36 = vector.multi_reduction <add>, %26, %cst_27 [1] : vector<8x256xf32> to vector<8xf32>
    %37 = vector.shape_cast %36 : vector<8xf32> to vector<8x1xf32>
    %c0_28 = arith.constant 0 : index
    %c0_29 = arith.constant 0 : index
    %38 = vector.load %arg11[%c0_28, %c0_29] : memref<8x1xf32, #tpu.memory_space<vmem>>, vector<8x1xf32>
    tpu.vector_store %arg11[%c0_28, %c0_29], %37 {strides = array<i32>} : memref<8x1xf32, #tpu.memory_space<vmem>>, vector<8x1xf32>,
    return
  }
  func.func @transform_0(%arg0: i32) -> (i32, i32) {
    %c0_i32 = arith.constant 0 : i32
    %c0_i32_0 = arith.constant 0 : i32
    return %arg0, %c0_i32 : i32, i32
  }
  func.func @transform_1(%arg0: i32) -> (i32, i32) {
    %c0_i32 = arith.constant 0 : i32
    %c0_i32_0 = arith.constant 0 : i32
    %c0_i32_1 = arith.constant 0 : i32
    return %c0_i32, %c0_i32_0 : i32, i32
  }
  func.func @transform_2(%arg0: i32) -> (i32, i32) {
    %c0_i32 = arith.constant 0 : i32
    %c0_i32_0 = arith.constant 0 : i32
    %c0_i32_1 = arith.constant 0 : i32
    return %c0_i32, %c0_i32_0 : i32, i32
  }
  func.func @transform_3(%arg0: i32) -> (i32, i32) {
    %c0_i32 = arith.constant 0 : i32
    %c0_i32_0 = arith.constant 0 : i32
    %c0_i32_1 = arith.constant 0 : i32
    return %c0_i32, %c0_i32_0 : i32, i32
  }
  func.func @transform_4(%arg0: i32) -> (i32, i32) {
    %c0_i32 = arith.constant 0 : i32
    %c0_i32_0 = arith.constant 0 : i32
    %c0_i32_1 = arith.constant 0 : i32
    return %c0_i32, %c0_i32_0 : i32, i32
  }
  func.func @transform_5(%arg0: i32) -> (i32, i32) {
    %c0_i32 = arith.constant 0 : i32
    %c0_i32_0 = arith.constant 0 : i32
    %c0_i32_1 = arith.constant 0 : i32
    return %c0_i32, %c0_i32_0 : i32, i32
  }
  func.func @transform_6(%arg0: i32) -> (i32, i32) {
    %c0_i32 = arith.constant 0 : i32
    %c0_i32_0 = arith.constant 0 : i32
    %c0_i32_1 = arith.constant 0 : i32
    return %c0_i32, %c0_i32_0 : i32, i32
  }
  func.func @transform_7(%arg0: i32) -> (i32, i32) {
    %c0_i32 = arith.constant 0 : i32
    %c0_i32_0 = arith.constant 0 : i32
    %c0_i32_1 = arith.constant 0 : i32
    return %c0_i32, %c0_i32_0 : i32, i32
  }
  func.func @transform_8(%arg0: i32) -> (i32, i32) {
    %c0_i32 = arith.constant 0 : i32
    %c0_i32_0 = arith.constant 0 : i32
    %c0_i32_1 = arith.constant 0 : i32
    return %c0_i32, %c0_i32_0 : i32, i32
  }
  func.func @transform_9(%arg0: i32) -> (i32, i32) {
    %c0_i32 = arith.constant 0 : i32
    %c0_i32_0 = arith.constant 0 : i32
    return %arg0, %c0_i32 : i32, i32
  }
  func.func @transform_10(%arg0: i32) -> (i32, i32) {
    %c0_i32 = arith.constant 0 : i32
    %c0_i32_0 = arith.constant 0 : i32
    return %arg0, %c0_i32 : i32, i32
  }
}

</mosaic_0001>

<bundles_post_ra>
// kernel: _affine_coupling_fwd.1
= control target key start
LH: loop header
LB: loop body
LE: loop exit
PB: predicated region body
PF: predicated region fallthrough
CT: control target
= control target key end

     0   :  { %vm1063_vm0 = vcmask 7168   ;;  %s2585_s1 = inlined_call_operand.vmem [shape: bf16[256,256], index: 1, kind: input, shape index: {}]   ;;  %s2586_s3 = inlined_call_operand.vmem [shape: bf16[256,256], index: 3, kind: input, shape index: {}]   ;;  %s2587_s0 = inlined_call_operand.vmem [shape: f32[8,256], index: 0, kind: input, shape index: {}]   ;;  %s2588_s5 = inlined_call_operand.vmem [shape: bf16[256,256], index: 5, kind: input, shape index: {}]   ;;  %s2589_s2 = inlined_call_operand.vmem [shape: f32[1,256], index: 2, kind: input, shape index: {}]   ;;  %s2590_s7 = inlined_call_operand.vmem [shape: bf16[256,256], index: 7, kind: input, shape index: {}]   ;;  %s2591_s4 = inlined_call_operand.vmem [shape: f32[1,256], index: 4, kind: input, shape index: {}]   ;;  %s2592_s6 = inlined_call_operand.vmem [shape: f32[1,256], index: 6, kind: input, shape index: {}]   ;;  %s2593_s8 = inlined_call_operand.vmem [shape: f32[1,256], index: 8, kind: input, shape index: {}]   ;;  %s2594_s9 = inlined_call_operand.vmem [shape: f32[8,256], index: 9, kind: output, shape index: {0}]   ;;  %s2595_s10 = inlined_call_operand.vmem [shape: f32[8,1], index: 10, kind: output, shape index: {1}]  }
   0x1   :  { %v1131_v0 = vld [vmem:[%s2585_s1 + $0x70] sm:$0xf]  ;;  %v1600_v1 = vld [vmem:[%s2585_s1 + $0x74] sm:$0xf0]  ;;  %v1599_v5 = vld [vmem:[%s2585_s1 + $0x74] sm:$0xf] }
   0x2   :  { %v1195_v2 = vld [vmem:[%s2585_s1 + $0xf0] sm:$0xf]  ;;  %v1132_v3 = vor.u32 %v1600_v1, %v1131_v0  ;;  %v1616_v4 = vld [vmem:[%s2585_s1 + $0xf4] sm:$0xf0]  ;;  %v1133_v6 = vld [vmem:[%s2585_s1 + $0x78] sm:$0xf0] }
   0x3   :  { %v1196_v7 = vor.u32 %v1616_v4, %v1195_v2  ;;  %v1136_v8 = vor.u32 %v1599_v5, %v1133_v6  ;;  %v1615_v9 = vld [vmem:[%s2585_s1 + $0xf4] sm:$0xf]  ;;  %v1197_v10 = vld [vmem:[%s2585_s1 + $0xf8] sm:$0xf0]  ;;  %v1123_v11 = vld [vmem:[%s2585_s1 + $0x60] sm:$0xf] }
   0x4   :  { %236 = vmatpush.bf16.msra.mxu0 %v1132_v3  ;;  %v1200_v12 = vor.u32 %v1615_v9, %v1197_v10  ;;  %v1598_v13 = vld [vmem:[%s2585_s1 + $0x64] sm:$0xf0]  ;;  %v1187_v14 = vld [vmem:[%s2585_s1 + $0xe0] sm:$0xf]  ;;  %v1597_v18 = vld [vmem:[%s2585_s1 + $0x64] sm:$0xf] }
   0x5   :  { %v1614_v15 = vld [vmem:[%s2585_s1 + $0xe4] sm:$0xf0]  ;;  %249 = vmatpush.bf16.msra.mxu1 %v1196_v7  ;;  %262 = vmatpush.bf16.msra.mxu2 %v1136_v8  ;;  %v1124_v16 = vor.u32 %v1598_v13, %v1123_v11  ;;  %v1125_v19 = vld [vmem:[%s2585_s1 + $0x68] sm:$0xf0]  ;;  %v1613_v20 = vld [vmem:[%s2585_s1 + $0xe4] sm:$0xf] }
   0x6   :  { %v1188_v17 = vor.u32 %v1614_v15, %v1187_v14  ;;  %275 = vmatpush.bf16.msra.mxu3 %v1200_v12  ;;  %v1128_v21 = vor.u32 %v1597_v18, %v1125_v19  ;;  %v1189_v22 = vld [vmem:[%s2585_s1 + $0xe8] sm:$0xf0]  ;;  %v1115_v23 = vld [vmem:[%s2585_s1 + $0x50] sm:$0xf]  ;;  %v1596_v24 = vld [vmem:[%s2585_s1 + $0x54] sm:$0xf0] }
   0x7   :  { %v1192_v25 = vor.u32 %v1613_v20, %v1189_v22  ;;  %v1179_v26 = vld [vmem:[%s2585_s1 + $0xd0] sm:$0xf]  ;;  %v1612_v27 = vld [vmem:[%s2585_s1 + $0xd4] sm:$0xf0]  ;;  %v1595_v28 = vld [vmem:[%s2585_s1 + $0x54] sm:$0xf]  ;;  %v1116_v29 = vor.u32 %v1596_v24, %v1115_v23 }
   0x8   :  { %237 = vmatpush.bf16.msra.mxu0 %v1124_v16  ;;  %v1117_v30 = vld [vmem:[%s2585_s1 + $0x58] sm:$0xf0]  ;;  %v1611_v31 = vld [vmem:[%s2585_s1 + $0xd4] sm:$0xf]  ;;  %v1180_v33 = vor.u32 %v1612_v27, %v1179_v26  ;;  %v1107_v35 = vld [vmem:[%s2585_s1 + $0x40] sm:$0xf] }
   0x9   :  { %v1181_v32 = vld [vmem:[%s2585_s1 + $0xd8] sm:$0xf0]  ;;  %250 = vmatpush.bf16.msra.mxu1 %v1188_v17  ;;  %263 = vmatpush.bf16.msra.mxu2 %v1128_v21  ;;  %v1120_v34 = vor.u32 %v1595_v28, %v1117_v30  ;;  %v1594_v36 = vld [vmem:[%s2585_s1 + $0x44] sm:$0xf0]  ;;  %v1171_v37 = vld [vmem:[%s2585_s1 + $0xc0] sm:$0xf] }
   0xa   :  { %276 = vmatpush.bf16.msra.mxu3 %v1192_v25  ;;  %v1184_v38 = vor.u32 %v1611_v31, %v1181_v32  ;;  %v1610_v39 = vld [vmem:[%s2585_s1 + $0xc4] sm:$0xf0]  ;;  %v1593_v40 = vld [vmem:[%s2585_s1 + $0x44] sm:$0xf]  ;;  %v1109_v41 = vld [vmem:[%s2585_s1 + $0x48] sm:$0xf0]  ;;  %v1108_v44 = vor.u32 %v1594_v36, %v1107_v35 }
   0xb   :  { %v1609_v42 = vld [vmem:[%s2585_s1 + $0xc4] sm:$0xf]  ;;  %v1173_v43 = vld [vmem:[%s2585_s1 + $0xc8] sm:$0xf0]  ;;  %v1172_v45 = vor.u32 %v1610_v39, %v1171_v37  ;;  %v1112_v46 = vor.u32 %v1593_v40, %v1109_v41  ;;  %v1099_v47 = vld [vmem:[%s2585_s1 + $0x30] sm:$0xf] }
   0xc   :  { %238 = vmatpush.bf16.msra.mxu0 %v1116_v29  ;;  %v1592_v48 = vld [vmem:[%s2585_s1 + $0x34] sm:$0xf0]  ;;  %v1163_v49 = vld [vmem:[%s2585_s1 + $0xb0] sm:$0xf]  ;;  %v1176_v50 = vor.u32 %v1609_v42, %v1173_v43  ;;  %v1591_v52 = vld [vmem:[%s2585_s1 + $0x34] sm:$0xf] }
   0xd   :  { %251 = vmatpush.bf16.msra.mxu1 %v1180_v33  ;;  %264 = vmatpush.bf16.msra.mxu2 %v1120_v34  ;;  %v1608_v51 = vld [vmem:[%s2585_s1 + $0xb4] sm:$0xf0]  ;;  %v1101_v53 = vld [vmem:[%s2585_s1 + $0x38] sm:$0xf0]  ;;  %v1607_v54 = vld [vmem:[%s2585_s1 + $0xb4] sm:$0xf]  ;;  %v1100_v56 = vor.u32 %v1592_v48, %v1099_v47 }
   0xe   :  { %277 = vmatpush.bf16.msra.mxu3 %v1184_v38  ;;  %v1165_v55 = vld [vmem:[%s2585_s1 + $0xb8] sm:$0xf0]  ;;  %v1164_v57 = vor.u32 %v1608_v51, %v1163_v49  ;;  %v1104_v58 = vor.u32 %v1591_v52, %v1101_v53  ;;  %v1091_v59 = vld [vmem:[%s2585_s1 + $0x20] sm:$0xf]  ;;  %v1590_v60 = vld [vmem:[%s2585_s1 + $0x24] sm:$0xf0] }
   0xf   :  { %v1155_v61 = vld [vmem:[%s2585_s1 + $0xa0] sm:$0xf]  ;;  %v1168_v62 = vor.u32 %v1607_v54, %v1165_v55  ;;  %v1606_v63 = vld [vmem:[%s2585_s1 + $0xa4] sm:$0xf0]  ;;  %v1589_v0 = vld [vmem:[%s2585_s1 + $0x24] sm:$0xf]  ;;  %v1092_v4 = vor.u32 %v1590_v60, %v1091_v59 }
  0x10   :  { %239 = vmatpush.bf16.msra.mxu0 %v1108_v44  ;;  %v1093_v1 = vld [vmem:[%s2585_s1 + $0x28] sm:$0xf0]  ;;  %v1605_v2 = vld [vmem:[%s2585_s1 + $0xa4] sm:$0xf]  ;;  %v1156_v5 = vor.u32 %v1606_v63, %v1155_v61  ;;  %v1083_v7 = vld [vmem:[%s2585_s1 + $0x10] sm:$0xf] }
  0x11   :  { %252 = vmatpush.bf16.msra.mxu1 %v1172_v45  ;;  %265 = vmatpush.bf16.msra.mxu2 %v1112_v46  ;;  %v1157_v3 = vld [vmem:[%s2585_s1 + $0xa8] sm:$0xf0]  ;;  %v1096_v6 = vor.u32 %v1589_v0, %v1093_v1  ;;  %v1588_v8 = vld [vmem:[%s2585_s1 + $0x14] sm:$0xf0]  ;;  %v1147_v9 = vld [vmem:[%s2585_s1 + $0x90] sm:$0xf] }
  0x12   :  { %278 = vmatpush.bf16.msra.mxu3 %v1176_v50  ;;  %v1160_v10 = vor.u32 %v1605_v2, %v1157_v3  ;;  %v1604_v11 = vld [vmem:[%s2585_s1 + $0x94] sm:$0xf0]  ;;  %v1587_v12 = vld [vmem:[%s2585_s1 + $0x14] sm:$0xf]  ;;  %v1085_v13 = vld [vmem:[%s2585_s1 + $0x18] sm:$0xf0]  ;;  %v1084_v16 = vor.u32 %v1588_v8, %v1083_v7 }
  0x13   :  { %v1603_v14 = vld [vmem:[%s2585_s1 + $0x94] sm:$0xf]  ;;  %v1149_v15 = vld [vmem:[%s2585_s1 + $0x98] sm:$0xf0]  ;;  %v1075_v17 = vld [vmem:[%s2585_s1] sm:$0xf]  ;;  %v1148_v18 = vor.u32 %v1604_v11, %v1147_v9  ;;  %v1088_v19 = vor.u32 %v1587_v12, %v1085_v13 }
  0x14   :  { %240 = vmatpush.bf16.msra.mxu0 %v1100_v56  ;;  %v1586_v20 = vld [vmem:[%s2585_s1 + $0x4] sm:$0xf0]  ;;  %v1139_v21 = vld [vmem:[%s2585_s1 + $0x80] sm:$0xf]  ;;  %v1152_v23 = vor.u32 %v1603_v14, %v1149_v15  ;;  %v1585_v24 = vld [vmem:[%s2585_s1 + $0x4] sm:$0xf] }
  0x15   :  { %253 = vmatpush.bf16.msra.mxu1 %v1164_v57  ;;  %266 = vmatpush.bf16.msra.mxu2 %v1104_v58  ;;  %v1602_v22 = vld [vmem:[%s2585_s1 + $0x84] sm:$0xf0]  ;;  %v1077_v25 = vld [vmem:[%s2585_s1 + $0x8] sm:$0xf0]  ;;  %v1601_v26 = vld [vmem:[%s2585_s1 + $0x84] sm:$0xf]  ;;  %v1076_v30 = vor.u32 %v1586_v20, %v1075_v17 }
  0x16   :  { %279 = vmatpush.bf16.msra.mxu3 %v1168_v62  ;;  %v1141_v27 = vld [vmem:[%s2585_s1 + $0x88] sm:$0xf0]  ;;  %v1259_v28 = vld [vmem:[%s2586_s3 + $0x70] sm:$0xf]  ;;  %v1632_v29 = vld [vmem:[%s2586_s3 + $0x74] sm:$0xf0]  ;;  %v1140_v34 = vor.u32 %v1602_v22, %v1139_v21  ;;  %v1080_v35 = vor.u32 %v1585_v24, %v1077_v25 }
  0x17   :  { %v1977_v31 = vld [vmem:[%s2587_s0] sm:$0xff]  ;;  %v1631_v32 = vld [vmem:[%s2586_s3 + $0x74] sm:$0xf]  ;;  %v1261_v33 = vld [vmem:[%s2586_s3 + $0x78] sm:$0xf0]  ;;  %v1144_v37 = vor.u32 %v1601_v26, %v1141_v27  ;;  %v1260_v38 = vor.u32 %v1632_v29, %v1259_v28 }
  0x18   :  { %241 = vmatpush.bf16.msra.mxu0 %v1092_v4  ;;  %v1988_v36 = vld [vmem:[%s2587_s0 + $0x8] sm:$0xff]  ;;  %v1251_v39 = vld [vmem:[%s2586_s3 + $0x60] sm:$0xf]  ;;  %v1323_v40 = vld [vmem:[%s2586_s3 + $0xf0] sm:$0xf]  ;;  %v36_v42 = vpack.c.bf16 %v1977_v31, %v1977_v31  ;;  %v1264_v43 = vor.u32 %v1631_v32, %v1261_v33 }
  0x19   :  { %254 = vmatpush.bf16.msra.mxu1 %v1156_v5  ;;  %267 = vmatpush.bf16.msra.mxu2 %v1096_v6  ;;  %v1648_v41 = vld [vmem:[%s2586_s3 + $0xf4] sm:$0xf0]  ;;  %v1630_v44 = vld [vmem:[%s2586_s3 + $0x64] sm:$0xf0]  ;;  %v1647_v45 = vld [vmem:[%s2586_s3 + $0xf4] sm:$0xf]  ;;  %v37_v47 = vpack.c.bf16 %v1988_v36, %v1988_v36 }
  0x1a   :  { %280 = vmatpush.bf16.msra.mxu3 %v1160_v10  ;;  %v1325_v46 = vld [vmem:[%s2586_s3 + $0xf8] sm:$0xf0]  ;;  %v1629_v48 = vld [vmem:[%s2586_s3 + $0x64] sm:$0xf]  ;;  %v1253_v49 = vld [vmem:[%s2586_s3 + $0x68] sm:$0xf0]  ;;  %v1324_v50 = vor.u32 %v1648_v41, %v1323_v40  ;;  %v1252_v51 = vor.u32 %v1630_v44, %v1251_v39 }
  0x1b   :  { %v1328_v52 = vor.u32 %v1647_v45, %v1325_v46  ;;  %v1243_v53 = vld [vmem:[%s2586_s3 + $0x50] sm:$0xf]  ;;  %v1315_v54 = vld [vmem:[%s2586_s3 + $0xe0] sm:$0xf]  ;;  %v1646_v55 = vld [vmem:[%s2586_s3 + $0xe4] sm:$0xf0]  ;;  %v1256_v56 = vor.u32 %v1629_v48, %v1253_v49 }
  0x1c   :  { %242 = vmatpush.bf16.msra.mxu0 %v1084_v16  ;;  %v1628_v57 = vld [vmem:[%s2586_s3 + $0x54] sm:$0xf0]  ;;  %v1645_v58 = vld [vmem:[%s2586_s3 + $0xe4] sm:$0xf]  ;;  %v1317_v59 = vld [vmem:[%s2586_s3 + $0xe8] sm:$0xf0]  ;;  %v1316_v62 = vor.u32 %v1646_v55, %v1315_v54 }
  0x1d   :  { %255 = vmatpush.bf16.msra.mxu1 %v1148_v18  ;;  %268 = vmatpush.bf16.msra.mxu2 %v1088_v19  ;;  %v1627_v60 = vld [vmem:[%s2586_s3 + $0x54] sm:$0xf]  ;;  %v1245_v61 = vld [vmem:[%s2586_s3 + $0x58] sm:$0xf0]  ;;  %v1244_v63 = vor.u32 %v1628_v57, %v1243_v53  ;;  %v1320_v0 = vor.u32 %v1645_v58, %v1317_v59  ;;  %v1235_v1 = vld [vmem:[%s2586_s3 + $0x40] sm:$0xf] }
  0x1e   :  { %281 = vmatpush.bf16.msra.mxu3 %v1152_v23  ;;  %v1307_v2 = vld [vmem:[%s2586_s3 + $0xd0] sm:$0xf]  ;;  %v1644_v3 = vld [vmem:[%s2586_s3 + $0xd4] sm:$0xf0]  ;;  %v1248_v4 = vor.u32 %v1627_v60, %v1245_v61  ;;  %v1626_v5 = vld [vmem:[%s2586_s3 + $0x44] sm:$0xf0] }
  0x1f   :  { %v1643_v6 = vld [vmem:[%s2586_s3 + $0xd4] sm:$0xf]  ;;  %v1309_v7 = vld [vmem:[%s2586_s3 + $0xd8] sm:$0xf0]  ;;  %v1625_v8 = vld [vmem:[%s2586_s3 + $0x44] sm:$0xf]  ;;  %v1308_v10 = vor.u32 %v1644_v3, %v1307_v2  ;;  %v1236_v11 = vor.u32 %v1626_v5, %v1235_v1 }
  0x20   :  { %243 = vmatpush.bf16.msra.mxu0 %v1076_v30  ;;  %v1237_v9 = vld [vmem:[%s2586_s3 + $0x48] sm:$0xf0]  ;;  %v1312_v12 = vor.u32 %v1643_v6, %v1309_v7  ;;  %v1227_v13 = vld [vmem:[%s2586_s3 + $0x30] sm:$0xf]  ;;  %v1299_v14 = vld [vmem:[%s2586_s3 + $0xc0] sm:$0xf] }
  0x21   :  { %256 = vmatpush.bf16.msra.mxu1 %v1140_v34  ;;  %269 = vmatpush.bf16.msra.mxu2 %v1080_v35  ;;  %v1642_v15 = vld [vmem:[%s2586_s3 + $0xc4] sm:$0xf0]  ;;  %v1240_v16 = vor.u32 %v1625_v8, %v1237_v9  ;;  %v1624_v17 = vld [vmem:[%s2586_s3 + $0x34] sm:$0xf0]  ;;  %v1641_v18 = vld [vmem:[%s2586_s3 + $0xc4] sm:$0xf] }
  0x22   :  { %282 = vmatpush.bf16.msra.mxu3 %v1144_v37  ;;  %v1301_v19 = vld [vmem:[%s2586_s3 + $0xc8] sm:$0xf0]  ;;  %v1623_v20 = vld [vmem:[%s2586_s3 + $0x34] sm:$0xf]  ;;  %v1229_v21 = vld [vmem:[%s2586_s3 + $0x38] sm:$0xf0]  ;;  %v1300_v22 = vor.u32 %v1642_v15, %v1299_v14  ;;  %v1228_v23 = vor.u32 %v1624_v17, %v1227_v13 }
  0x23   :  { %244 = vmatmul.bf16.vlgmr.msra.gmra.mxu0 %v36_v42  ;;  %v1304_v24 = vor.u32 %v1641_v18, %v1301_v19  ;;  %v1232_v25 = vor.u32 %v1623_v20, %v1229_v21  ;;  %v1219_v26 = vld [vmem:[%s2586_s3 + $0x20] sm:$0xf]  ;;  %v1622_v27 = vld [vmem:[%s2586_s3 + $0x24] sm:$0xf0]  ;;  %v1621_v28 = vld [vmem:[%s2586_s3 + $0x24] sm:$0xf] }
  0x24   :  { %490 = vmatpush.bf16.msrb.mxu0 %v1260_v38  ;;  %257 = vmatmul.bf16.vlgmr.msra.gmra.mxu1 %v37_v47  ;;  %v1221_v29 = vld [vmem:[%s2586_s3 + $0x28] sm:$0xf0]  ;;  %v1220_v30 = vor.u32 %v1622_v27, %v1219_v26  ;;  %v1291_v33 = vld [vmem:[%s2586_s3 + $0xb0] sm:$0xf]  ;;  %v1640_v34 = vld [vmem:[%s2586_s3 + $0xb4] sm:$0xf0] }
  0x25   :  { %516 = vmatpush.bf16.msrb.mxu2 %v1264_v43  ;;  %283 = vmatmul.bf16.vlgmr.msra.gmra.mxu3 %v37_v47  ;;  %v1224_v32 = vor.u32 %v1621_v28, %v1221_v29  ;;  %v1639_v35 = vld [vmem:[%s2586_s3 + $0xb4] sm:$0xf]  ;;  %v1292_v37 = vor.u32 %v1640_v34, %v1291_v33  ;;  %v1293_v38 = vld [vmem:[%s2586_s3 + $0xb8] sm:$0xf0]  ;;  %v1211_v40 = vld [vmem:[%s2586_s3 + $0x10] sm:$0xf] }
  0x26   :  { %270 = vmatmul.bf16.vlgmr.msra.gmra.mxu2 %v36_v42  ;;  %503 = vmatpush.bf16.msrb.mxu1 %v1324_v50  ;;  %v1296_v39 = vor.u32 %v1639_v35, %v1293_v38  ;;  %v1620_v41 = vld [vmem:[%s2586_s3 + $0x14] sm:$0xf0]  ;;  %v1619_v42 = vld [vmem:[%s2586_s3 + $0x14] sm:$0xf]  ;;  %v1213_v44 = vld [vmem:[%s2586_s3 + $0x18] sm:$0xf0] }
  0x27   :  { %529 = vmatpush.bf16.msrb.mxu3 %v1328_v52  ;;  %v1212_v43 = vor.u32 %v1620_v41, %v1211_v40  ;;  %v1216_v45 = vor.u32 %v1619_v42, %v1213_v44  ;;  %v1283_v46 = vld [vmem:[%s2586_s3 + $0xa0] sm:$0xf]  ;;  %v1638_v47 = vld [vmem:[%s2586_s3 + $0xa4] sm:$0xf0]  ;;  %v1637_v48 = vld [vmem:[%s2586_s3 + $0xa4] sm:$0xf] }
  0x28   :  { %491 = vmatpush.bf16.msrb.mxu0 %v1252_v51  ;;  %v1284_v49 = vor.u32 %v1638_v47, %v1283_v46  ;;  %v1285_v50 = vld [vmem:[%s2586_s3 + $0xa8] sm:$0xf0]  ;;  %v1203_v52 = vld [vmem:[%s2586_s3] sm:$0xf]  ;;  %v1618_v53 = vld [vmem:[%s2586_s3 + $0x4] sm:$0xf0] }
  0x29   :  { %517 = vmatpush.bf16.msrb.mxu2 %v1256_v56  ;;  %v1288_v51 = vor.u32 %v1637_v48, %v1285_v50  ;;  %v1617_v54 = vld [vmem:[%s2586_s3 + $0x4] sm:$0xf]  ;;  %v1204_v55 = vor.u32 %v1618_v53, %v1203_v52  ;;  %v1205_v56 = vld [vmem:[%s2586_s3 + $0x8] sm:$0xf0]  ;;  %v1275_v58 = vld [vmem:[%s2586_s3 + $0x90] sm:$0xf] }
  0x2a   :  { %504 = vmatpush.bf16.msrb.mxu1 %v1316_v62  ;;  %v1208_v57 = vor.u32 %v1617_v54, %v1205_v56  ;;  %v1636_v59 = vld [vmem:[%s2586_s3 + $0x94] sm:$0xf0]  ;;  %v1635_v61 = vld [vmem:[%s2586_s3 + $0x94] sm:$0xf]  ;;  %v1277_v62 = vld [vmem:[%s2586_s3 + $0x98] sm:$0xf0] }
  0x2b   :  { %530 = vmatpush.bf16.msrb.mxu3 %v1320_v0  ;;  %v1276_v60 = vor.u32 %v1636_v59, %v1275_v58  ;;  %v1267_v0 = vld [vmem:[%s2586_s3 + $0x80] sm:$0xf]  ;;  %v1634_v1 = vld [vmem:[%s2586_s3 + $0x84] sm:$0xf0]  ;;  %v1633_v2 = vld [vmem:[%s2586_s3 + $0x84] sm:$0xf] }
  0x2c   :  { %492 = vmatpush.bf16.msrb.mxu0 %v1244_v63  ;;  %v1280_v63 = vor.u32 %v1635_v61, %v1277_v62  ;;  %v1268_v3 = vor.u32 %v1634_v1, %v1267_v0  ;;  %v1387_v6 = vld [vmem:[%s2588_s5 + $0x70] sm:$0xf]  ;;  %v1664_v7 = vld [vmem:[%s2588_s5 + $0x74] sm:$0xf0]  ;;  %v1663_v8 = vld [vmem:[%s2588_s5 + $0x74] sm:$0xf] }
  0x2d   :  { %518 = vmatpush.bf16.msrb.mxu2 %v1248_v4  ;;  %v1269_v4 = vld [vmem:[%s2586_s3 + $0x88] sm:$0xf0]  ;;  %v1388_v9 = vor.u32 %v1664_v7, %v1387_v6  ;;  %v1661_v14 = vld [vmem:[%s2588_s5 + $0x64] sm:$0xf]  ;;  %v1680_v18 = vld [vmem:[%s2588_s5 + $0xf4] sm:$0xf0] }
  0x2e   :  { %505 = vmatpush.bf16.msrb.mxu1 %v1308_v10  ;;  %v1272_v5 = vor.u32 %v1633_v2, %v1269_v4  ;;  %v1389_v10 = vld [vmem:[%s2588_s5 + $0x78] sm:$0xf0]  ;;  %v1381_v15 = vld [vmem:[%s2588_s5 + $0x68] sm:$0xf0]  ;;  %v1679_v19 = vld [vmem:[%s2588_s5 + $0xf4] sm:$0xf] }
  0x2f   :  { %531 = vmatpush.bf16.msrb.mxu3 %v1312_v12  ;;  %v1662_v12 = vld [vmem:[%s2588_s5 + $0x64] sm:$0xf0]  ;;  %v1392_v13 = vor.u32 %v1663_v8, %v1389_v10  ;;  %v1453_v20 = vld [vmem:[%s2588_s5 + $0xf8] sm:$0xf0]  ;;  %v1384_v21 = vor.u32 %v1661_v14, %v1381_v15  ;;  %v1659_v26 = vld [vmem:[%s2588_s5 + $0x54] sm:$0xf] }
  0x30   :  { %493 = vmatpush.bf16.msrb.mxu0 %v1236_v11  ;;  %v1379_v11 = vld [vmem:[%s2588_s5 + $0x60] sm:$0xf]  ;;  %v1373_v27 = vld [vmem:[%s2588_s5 + $0x58] sm:$0xf0]  ;;  %v1678_v29 = vld [vmem:[%s2588_s5 + $0xe4] sm:$0xf0] }
  0x31   :  { %519 = vmatpush.bf16.msrb.mxu2 %v1240_v16  ;;  %v1451_v16 = vld [vmem:[%s2588_s5 + $0xf0] sm:$0xf]  ;;  %v1380_v17 = vor.u32 %v1662_v12, %v1379_v11  ;;  %v1443_v28 = vld [vmem:[%s2588_s5 + $0xe0] sm:$0xf]  ;;  %v1445_v33 = vld [vmem:[%s2588_s5 + $0xe8] sm:$0xf0] }
  0x32   :  { %506 = vmatpush.bf16.msrb.mxu1 %v1300_v22  ;;  %v1452_v22 = vor.u32 %v1680_v18, %v1451_v16  ;;  %v1658_v38 = vld [vmem:[%s2588_s5 + $0x44] sm:$0xf0]  ;;  %v1435_v40 = vld [vmem:[%s2588_s5 + $0xd0] sm:$0xf]  ;;  %v1676_v41 = vld [vmem:[%s2588_s5 + $0xd4] sm:$0xf0] }
  0x33   :  { %532 = vmatpush.bf16.msrb.mxu3 %v1304_v24  ;;  %v1371_v24 = vld [vmem:[%s2588_s5 + $0x50] sm:$0xf]  ;;  %v1675_v42 = vld [vmem:[%s2588_s5 + $0xd4] sm:$0xf]  ;;  %v1365_v44 = vld [vmem:[%s2588_s5 + $0x48] sm:$0xf0]  ;;  %v1436_v47 = vor.u32 %v1676_v41, %v1435_v40 }
  0x34   :  { %494 = vmatpush.bf16.msrb.mxu0 %v1228_v23  ;;  %v1456_v23 = vor.u32 %v1679_v19, %v1453_v20  ;;  %v2261_v46 = vld [vmem:[%s2589_s2] sm:$0x3]  ;;  %v1673_v52 = vld [vmem:[%s2588_s5 + $0xc4] sm:$0xf]  ;;  %v1429_v53 = vld [vmem:[%s2588_s5 + $0xc8] sm:$0xf0] }
  0x35   :  { %520 = vmatpush.bf16.msrb.mxu2 %v1232_v25  ;;  %v1660_v25 = vld [vmem:[%s2588_s5 + $0x54] sm:$0xf0]  ;;  %v1655_v58 = vld [vmem:[%s2588_s5 + $0x34] sm:$0xf]  ;;  %v1357_v59 = vld [vmem:[%s2588_s5 + $0x38] sm:$0xf0]  ;;  %v1432_v61 = vor.u32 %v1673_v52, %v1429_v53 }
  0x36   :  { %507 = vmatpush.bf16.msrb.mxu1 %v1292_v37  ;;  %v1372_v34 = vor.u32 %v1660_v25, %v1371_v24  ;;  %v1363_v37 = vld [vmem:[%s2588_s5 + $0x40] sm:$0xf]  ;;  %v1656_v56 = vld [vmem:[%s2588_s5 + $0x34] sm:$0xf0]  ;;  %v1419_v62 = vld [vmem:[%s2588_s5 + $0xb0] sm:$0xf]  ;;  %v1360_v4 = vor.u32 %v1655_v58, %v1357_v59 }
  0x37   :  { %533 = vmatpush.bf16.msrb.mxu3 %v1296_v39  ;;  %v1376_v39 = vor.u32 %v1659_v26, %v1373_v27  ;;  %v1364_v50 = vor.u32 %v1658_v38, %v1363_v37  ;;  %v1672_v0 = vld [vmem:[%s2588_s5 + $0xb4] sm:$0xf0]  ;;  %v1671_v1 = vld [vmem:[%s2588_s5 + $0xb4] sm:$0xf]  ;;  %v1421_v2 = vld [vmem:[%s2588_s5 + $0xb8] sm:$0xf0] }
  0x38   :  { %495 = vmatpush.bf16.msrb.mxu0 %v1220_v30  ;;  %v1444_v30 = vor.u32 %v1678_v29, %v1443_v28  ;;  %v1654_v6 = vld [vmem:[%s2588_s5 + $0x24] sm:$0xf0]  ;;  %v1349_v10 = vld [vmem:[%s2588_s5 + $0x28] sm:$0xf0]  ;;  %v1420_v11 = vor.u32 %v1672_v0, %v1419_v62  ;;  %v1424_v12 = vor.u32 %v1671_v1, %v1421_v2  ;;  %v73_v19 = vperm.slane %v2261_v46, 1 }
  0x39   :  { %521 = vmatpush.bf16.msrb.mxu2 %v1224_v32  ;;  %v1677_v32 = vld [vmem:[%s2588_s5 + $0xe4] sm:$0xf]  ;;  %v1670_v16 = vld [vmem:[%s2588_s5 + $0xa4] sm:$0xf0]  ;;  %v1413_v18 = vld [vmem:[%s2588_s5 + $0xa8] sm:$0xf0] }
  0x3a   :  { %508 = vmatpush.bf16.msrb.mxu1 %v1284_v49  ;;  %v1448_v35 = vor.u32 %v1677_v32, %v1445_v33  ;;  %v1427_v49 = vld [vmem:[%s2588_s5 + $0xc0] sm:$0xf]  ;;  %v1651_v24 = vld [vmem:[%s2588_s5 + $0x14] sm:$0xf]  ;;  %v1341_v25 = vld [vmem:[%s2588_s5 + $0x18] sm:$0xf0] }
  0x3b   :  { %534 = vmatpush.bf16.msrb.mxu3 %v1288_v51  ;;  %v1674_v51 = vld [vmem:[%s2588_s5 + $0xc4] sm:$0xf0]  ;;  %v1403_v28 = vld [vmem:[%s2588_s5 + $0x90] sm:$0xf]  ;;  %v1668_v33 = vld [vmem:[%s2588_s5 + $0x94] sm:$0xf0]  ;;  %v1344_v40 = vor.u32 %v1651_v24, %v1341_v25 }
  0x3c   :  { %496 = vmatpush.bf16.msrb.mxu0 %v1212_v43  ;;  %v1657_v43 = vld [vmem:[%s2588_s5 + $0x44] sm:$0xf]  ;;  %v1331_v41 = vld [vmem:[%s2588_s5] sm:$0xf]  ;;  %v1695_v52 = vld [vmem:[%s2590_s7 + $0x74] sm:$0xf] }
  0x3d   :  { %522 = vmatpush.bf16.msrb.mxu2 %v1216_v45  ;;  %v1437_v45 = vld [vmem:[%s2588_s5 + $0xd8] sm:$0xf0]  ;;  %v1368_v54 = vor.u32 %v1657_v43, %v1365_v44  ;;  %v1649_v44 = vld [vmem:[%s2588_s5 + $0x4] sm:$0xf]  ;;  %v1694_v62 = vld [vmem:[%s2590_s7 + $0x64] sm:$0xf0] }
  0x3e   :  { %509 = vmatpush.bf16.msrb.mxu1 %v1276_v60  ;;  %v1440_v48 = vor.u32 %v1675_v42, %v1437_v45  ;;  %v1428_v60 = vor.u32 %v1674_v51, %v1427_v49  ;;  %v1650_v42 = vld [vmem:[%s2588_s5 + $0x4] sm:$0xf0]  ;;  %v1404_v49 = vor.u32 %v1668_v33, %v1403_v28  ;;  %v1517_v53 = vld [vmem:[%s2590_s7 + $0x78] sm:$0xf0]  ;;  %v1509_v1 = vld [vmem:[%s2590_s7 + $0x68] sm:$0xf0] }
  0x3f   :  { %535 = vmatpush.bf16.msrb.mxu3 %v1280_v63  ;;  %v1332_v51 = vor.u32 %v1650_v42, %v1331_v41  ;;  %v1520_v58 = vor.u32 %v1695_v52, %v1517_v53  ;;  %v1395_v2 = vld [vmem:[%s2588_s5 + $0x80] sm:$0xf]  ;;  %v1573_v25 = vld [vmem:[%s2590_s7 + $0xe8] sm:$0xf0]  ;;  %v1690_v28 = vld [vmem:[%s2590_s7 + $0x44] sm:$0xf0] }
  0x40   :  { %497 = vmatpush.bf16.msrb.mxu0 %v1204_v55  ;;  %v1355_v55 = vld [vmem:[%s2588_s5 + $0x30] sm:$0xf]  ;;  %v1688_v42 = vld [vmem:[%s2590_s7 + $0x34] sm:$0xf0]  ;;  %v1475_v53 = vld [vmem:[%s2590_s7 + $0x20] sm:$0xf] }
  0x41   :  { %523 = vmatpush.bf16.msrb.mxu2 %v1208_v57  ;;  %v72_v57 = vperm.slane %v2261_v46, 0  ;;  %v1356_v63 = vor.u32 %v1656_v56, %v1355_v55  ;;  %v1333_v46 = vld [vmem:[%s2588_s5 + $0x8] sm:$0xf0]  ;;  %v1483_v41 = vld [vmem:[%s2590_s7 + $0x30] sm:$0xf] }
  0x42   :  { %510 = vmatpush.bf16.msrb.mxu1 %v1268_v3  ;;  %v1336_v55 = vor.u32 %v1649_v44, %v1333_v46  ;;  %v1484_v44 = vor.u32 %v1688_v42, %v1483_v41 }
  0x43   :  { %536 = vmatpush.bf16.msrb.mxu3 %v1272_v5  ;;  %v1347_v5 = vld [vmem:[%s2588_s5 + $0x20] sm:$0xf] }
  0x44   :  { %744 = vmatpush.bf16.msra.mxu0 %v1388_v9  ;;  %v1653_v9 = vld [vmem:[%s2588_s5 + $0x24] sm:$0xf]  ;;  %v1348_v15 = vor.u32 %v1654_v6, %v1347_v5 }
  0x45   :  { %770 = vmatpush.bf16.msra.mxu2 %v1392_v13  ;;  %v1411_v13 = vld [vmem:[%s2588_s5 + $0xa0] sm:$0xf]  ;;  %v1352_v20 = vor.u32 %v1653_v9, %v1349_v10  ;;  %v1665_v6 = vld [vmem:[%s2588_s5 + $0x84] sm:$0xf]  ;;  %v1712_v10 = vld [vmem:[%s2590_s7 + $0xf4] sm:$0xf0] }
  0x46   :  { %757 = vmatpush.bf16.msra.mxu1 %v1452_v22  ;;  %v1652_v22 = vld [vmem:[%s2588_s5 + $0x14] sm:$0xf0]  ;;  %v1412_v26 = vor.u32 %v1670_v16, %v1411_v13 }
  0x47   :  { %783 = vmatpush.bf16.msra.mxu3 %v1456_v23  ;;  %v1692_v16 = vld [vmem:[%s2590_s7 + $0x54] sm:$0xf0] }
  0x48   :  { %745 = vmatpush.bf16.msra.mxu0 %v1380_v17  ;;  %v1669_v17 = vld [vmem:[%s2588_s5 + $0xa4] sm:$0xf] }
  0x49   :  { %771 = vmatpush.bf16.msra.mxu2 %v1384_v21  ;;  %v1339_v21 = vld [vmem:[%s2588_s5 + $0x10] sm:$0xf]  ;;  %v1416_v27 = vor.u32 %v1669_v17, %v1413_v18  ;;  %v1691_v17 = vld [vmem:[%s2590_s7 + $0x54] sm:$0xf] }
  0x4a   :  { %758 = vmatpush.bf16.msra.mxu1 %v1444_v30  ;;  %v1340_v32 = vor.u32 %v1652_v22, %v1339_v21  ;;  %v1571_v21 = vld [vmem:[%s2590_s7 + $0xe0] sm:$0xf]  ;;  %v1710_v22 = vld [vmem:[%s2590_s7 + $0xe4] sm:$0xf0] }
  0x4b   :  { %784 = vmatpush.bf16.msra.mxu3 %v1448_v35  ;;  %v1405_v35 = vld [vmem:[%s2588_s5 + $0x98] sm:$0xf0]  ;;  %v1572_v24 = vor.u32 %v1710_v22, %v1571_v21  ;;  %v1699_v21 = vld [vmem:[%s2590_s7 + $0x94] sm:$0xf] }
  0x4c   :  { %746 = vmatpush.bf16.msra.mxu0 %v1372_v34  ;;  %v1667_v34 = vld [vmem:[%s2588_s5 + $0x94] sm:$0xf]  ;;  %v1533_v22 = vld [vmem:[%s2590_s7 + $0x98] sm:$0xf0] }
  0x4d   :  { %772 = vmatpush.bf16.msra.mxu2 %v1376_v39 }
  0x4e   :  { %759 = vmatpush.bf16.msra.mxu1 %v1436_v47  ;;  %v1515_v47 = vld [vmem:[%s2590_s7 + $0x70] sm:$0xf] }
  0x4f   :  { %785 = vmatpush.bf16.msra.mxu3 %v1440_v48  ;;  %v1696_v48 = vld [vmem:[%s2590_s7 + $0x74] sm:$0xf0] }
  0x50   :  { %747 = vmatpush.bf16.msra.mxu0 %v1364_v50  ;;  %v1408_v50 = vor.u32 %v1667_v34, %v1405_v35  ;;  %v1516_v56 = vor.u32 %v1696_v48, %v1515_v47  ;;  %v1563_v34 = vld [vmem:[%s2590_s7 + $0xd0] sm:$0xf]  ;;  %v1708_v35 = vld [vmem:[%s2590_s7 + $0xd4] sm:$0xf0]  ;;  %v1555_v47 = vld [vmem:[%s2590_s7 + $0xc0] sm:$0xf] }
  0x51   :  { %773 = vmatpush.bf16.msra.mxu2 %v1368_v54  ;;  %v1706_v48 = vld [vmem:[%s2590_s7 + $0xc4] sm:$0xf0] }
  0x52   :  { %760 = vmatpush.bf16.msra.mxu1 %v1428_v60 }
  0x53   :  { %786 = vmatpush.bf16.msra.mxu3 %v1432_v61  ;;  %v1507_v61 = vld [vmem:[%s2590_s7 + $0x60] sm:$0xf] }
  0x54   :  { %748 = vmatpush.bf16.msra.mxu0 %v1356_v63  ;;  %v1693_v63 = vld [vmem:[%s2590_s7 + $0x64] sm:$0xf]  ;;  %v1508_v0 = vor.u32 %v1694_v62, %v1507_v61  ;;  %v1703_v61 = vld [vmem:[%s2590_s7 + $0xb4] sm:$0xf] }
  0x55   :  { %774 = vmatpush.bf16.msra.mxu2 %v1360_v4  ;;  %v1512_v4 = vor.u32 %v1693_v63, %v1509_v1  ;;  %v1549_v63 = vld [vmem:[%s2590_s7 + $0xb8] sm:$0xf0]  ;;  %v1467_v1 = vld [vmem:[%s2590_s7 + $0x10] sm:$0xf] }
  0x56   :  { %761 = vmatpush.bf16.msra.mxu1 %v1420_v11  ;;  %v1711_v11 = vld [vmem:[%s2590_s7 + $0xf4] sm:$0xf] }
  0x57   :  { %787 = vmatpush.bf16.msra.mxu3 %v1424_v12  ;;  %v1581_v12 = vld [vmem:[%s2590_s7 + $0xf8] sm:$0xf0] }
  0x58   :  { %749 = vmatpush.bf16.msra.mxu0 %v1348_v15  ;;  %v1499_v15 = vld [vmem:[%s2590_s7 + $0x50] sm:$0xf] }
  0x59   :  { %775 = vmatpush.bf16.msra.mxu2 %v1352_v20  ;;  %v1500_v18 = vor.u32 %v1692_v16, %v1499_v15  ;;  %v1681_v15 = vld [vmem:[%s2590_s7 + $0x4] sm:$0xf]  ;;  %v1461_v16 = vld [vmem:[%s2590_s7 + $0x8] sm:$0xf0] }
  0x5a   :  { %762 = vmatpush.bf16.msra.mxu1 %v1412_v26 }
  0x5b   :  { %788 = vmatpush.bf16.msra.mxu3 %v1416_v27  ;;  %v1491_v27 = vld [vmem:[%s2590_s7 + $0x40] sm:$0xf] }
  0x5c   :  { %750 = vmatpush.bf16.msra.mxu0 %v1340_v32  ;;  %v1493_v32 = vld [vmem:[%s2590_s7 + $0x48] sm:$0xf0] }
  0x5d   :  { %776 = vmatpush.bf16.msra.mxu2 %v1344_v40 }
  0x5e   :  { %763 = vmatpush.bf16.msra.mxu1 %v1404_v49  ;;  %v1705_v49 = vld [vmem:[%s2590_s7 + $0xc4] sm:$0xf] }
  0x5f   :  { %789 = vmatpush.bf16.msra.mxu3 %v1408_v50  ;;  %v1556_v50 = vor.u32 %v1706_v48, %v1555_v47 }
  0x60   :  { %751 = vmatpush.bf16.msra.mxu0 %v1332_v51  ;;  %v1557_v51 = vld [vmem:[%s2590_s7 + $0xc8] sm:$0xf0] }
  0x61   :  { %777 = vmatpush.bf16.msra.mxu2 %v1336_v55  ;;  %v1560_v52 = vor.u32 %v1705_v49, %v1557_v51  ;;  %v1685_v55 = vld [vmem:[%s2590_s7 + $0x24] sm:$0xf] }
  0xa0   :  { %v245_v3 = vpop.f32.mrf.mxu0 }
  0xa1   :  { %v246_v7 = vadd.f32 %v245_v3, %v72_v57  ;;  %v258_v8 = vpop.f32.mrf.mxu1  ;;  %v1666_v3 = vld [vmem:[%s2588_s5 + $0x84] sm:$0xf0] }
  0xa2   :  { %v1396_v5 = vor.u32 %v1666_v3, %v1395_v2  ;;  %v1684_v2 = vld [vmem:[%s2590_s7 + $0x14] sm:$0xf0]  ;;  %v1683_v3 = vld [vmem:[%s2590_s7 + $0x14] sm:$0xf] }
  0xa3   :  { %v259_v14 = vadd.f32 %v258_v8, %v246_v7  ;;  %v1397_v7 = vld [vmem:[%s2588_s5 + $0x88] sm:$0xf0]  ;;  %v1579_v8 = vld [vmem:[%s2590_s7 + $0xf0] sm:$0xf] }
  0xa4   :  { %v1400_v9 = vor.u32 %v1665_v6, %v1397_v7  ;;  %764 = vmatpush.bf16.msra.mxu1 %v1396_v5  ;;  %v1580_v13 = vor.u32 %v1712_v10, %v1579_v8  ;;  %v1469_v5 = vld [vmem:[%s2590_s7 + $0x18] sm:$0xf0]  ;;  %v1539_v6 = vld [vmem:[%s2590_s7 + $0xa0] sm:$0xf]  ;;  %v1702_v7 = vld [vmem:[%s2590_s7 + $0xa4] sm:$0xf0] }
  0xa5   :  { %v288_v23 = vmax.f32 %v259_v14, 0.0  ;;  %v1584_v14 = vor.u32 %v1711_v11, %v1581_v12  ;;  %v1472_v8 = vor.u32 %v1683_v3, %v1469_v5  ;;  %v1701_v10 = vld [vmem:[%s2590_s7 + $0xa4] sm:$0xf]  ;;  %v1541_v11 = vld [vmem:[%s2590_s7 + $0xa8] sm:$0xf0] }
  0xa6   :  { %790 = vmatpush.bf16.msra.mxu3 %v1400_v9  ;;  %v1540_v9 = vor.u32 %v1702_v7, %v1539_v6  ;;  %v1459_v12 = vld [vmem:[%s2590_s7] sm:$0xf] }
  0xa7   :  { %v290_v29 = vpack.c.bf16 %v288_v23, %v288_v23  ;;  %v1709_v23 = vld [vmem:[%s2590_s7 + $0xe4] sm:$0xf]  ;;  %v832_v5 = vld [vmem:[%s2593_s8] sm:$0x3] }
  0xa8   :  { %v284_v38 = vpop.f32.mrf.mxu3  ;;  %v247_v39 = vpop.f32.mrf.mxu0  ;;  %v1576_v26 = vor.u32 %v1709_v23, %v1573_v25  ;;  %v324_v25 = vld [vmem:[%s2591_s4] sm:$0x3] }
  0xa9   :  { %v271_v30 = vpop.f32.mrf.mxu2  ;;  %v260_v43 = vpop.f32.mrf.mxu1  ;;  %498 = vmatmul.bf16.vlgmr.msrb.gmra.mxu0 %v290_v29  ;;  %524 = vmatmul.bf16.vlgmr.msrb.gmra.mxu2 %v290_v29  ;;  %v1689_v29 = vld [vmem:[%s2590_s7 + $0x44] sm:$0xf]  ;;  %v1565_v39 = vld [vmem:[%s2590_s7 + $0xd8] sm:$0xf0] }
  0xaa   :  { %v272_v37 = vadd.f32 %v271_v30, %v73_v19  ;;  %998 = vmatpush.bf16.msrb.mxu0 %v1516_v56  ;;  %1024 = vmatpush.bf16.msrb.mxu2 %v1520_v58  ;;  %v1501_v19 = vld [vmem:[%s2590_s7 + $0x58] sm:$0xf0]  ;;  %v1492_v30 = vor.u32 %v1690_v28, %v1491_v27  ;;  %v1496_v33 = vor.u32 %v1689_v29, %v1493_v32  ;;  %v1687_v43 = vld [vmem:[%s2590_s7 + $0x34] sm:$0xf]  ;;  %v1698_v27 = vld [vmem:[%s2590_s7 + $0x84] sm:$0xf0] }
  0xab   :  { %v1504_v20 = vor.u32 %v1691_v17, %v1501_v19  ;;  %v1531_v19 = vld [vmem:[%s2590_s7 + $0x90] sm:$0xf]  ;;  %v1697_v28 = vld [vmem:[%s2590_s7 + $0x84] sm:$0xf]  ;;  %v326_v32 = vperm.slane %v324_v25, 0 }
  0xac   :  { %v285_v45 = vadd.f32 %v284_v38, %v272_v37  ;;  %v1564_v37 = vor.u32 %v1708_v35, %v1563_v34  ;;  %v1707_v38 = vld [vmem:[%s2590_s7 + $0xd4] sm:$0xf] }
  0xad   :  { %v1568_v40 = vor.u32 %v1707_v38, %v1565_v39 }
  0xae   :  { %v289_v54 = vmax.f32 %v285_v45, 0.0  ;;  %999 = vmatpush.bf16.msrb.mxu0 %v1508_v0  ;;  %1025 = vmatpush.bf16.msrb.mxu2 %v1512_v4  ;;  %v1485_v45 = vld [vmem:[%s2590_s7 + $0x38] sm:$0xf0]  ;;  %v1552_v0 = vor.u32 %v1703_v61, %v1549_v63  ;;  %v1468_v4 = vor.u32 %v1684_v2, %v1467_v1 }
  0xaf   :  { %v1488_v46 = vor.u32 %v1687_v43, %v1485_v45 }
  0xb0   :  { %v291_v57 = vpack.c.bf16 %v289_v54, %v289_v54  ;;  %v286_v60 = vpop.f32.mrf.mxu3  ;;  %v1686_v54 = vld [vmem:[%s2590_s7 + $0x24] sm:$0xf0] }
  0xb1   :  { %v273_v59 = vpop.f32.mrf.mxu2  ;;  %v1476_v56 = vor.u32 %v1686_v54, %v1475_v53  ;;  %v1704_v60 = vld [vmem:[%s2590_s7 + $0xb4] sm:$0xf0] }
  0xb2   :  { %511 = vmatmul.bf16.vlgmr.msrb.gmra.mxu1 %v291_v57  ;;  %537 = vmatmul.bf16.vlgmr.msrb.gmra.mxu3 %v291_v57  ;;  %v1477_v57 = vld [vmem:[%s2590_s7 + $0x28] sm:$0xf0]  ;;  %v1547_v59 = vld [vmem:[%s2590_s7 + $0xb0] sm:$0xf] }
  0xb3   :  { %1011 = vmatpush.bf16.msrb.mxu1 %v1580_v13  ;;  %1037 = vmatpush.bf16.msrb.mxu3 %v1584_v14  ;;  %v1480_v58 = vor.u32 %v1685_v55, %v1477_v57  ;;  %v1548_v62 = vor.u32 %v1704_v60, %v1547_v59  ;;  %v1544_v13 = vor.u32 %v1701_v10, %v1541_v11  ;;  %v1682_v14 = vld [vmem:[%s2590_s7 + $0x4] sm:$0xf0] }
  0xb4   :  { %1000 = vmatpush.bf16.msrb.mxu0 %v1500_v18  ;;  %1026 = vmatpush.bf16.msrb.mxu2 %v1504_v20  ;;  %v1460_v17 = vor.u32 %v1682_v14, %v1459_v12  ;;  %v1464_v18 = vor.u32 %v1681_v15, %v1461_v16  ;;  %v1700_v20 = vld [vmem:[%s2590_s7 + $0x94] sm:$0xf0] }
  0xb5   :  { %v1532_v23 = vor.u32 %v1700_v20, %v1531_v19  ;;  %v835_v19 = vperm.slane %v832_v5, 1 }
  0xb7   :  { %1012 = vmatpush.bf16.msrb.mxu1 %v1572_v24  ;;  %1038 = vmatpush.bf16.msrb.mxu3 %v1576_v26  ;;  %v1536_v24 = vor.u32 %v1699_v21, %v1533_v22  ;;  %v1523_v26 = vld [vmem:[%s2590_s7 + $0x80] sm:$0xf] }
  0xb8   :  { %1001 = vmatpush.bf16.msrb.mxu0 %v1492_v30  ;;  %1027 = vmatpush.bf16.msrb.mxu2 %v1496_v33  ;;  %v1524_v29 = vor.u32 %v1698_v27, %v1523_v26  ;;  %v1525_v30 = vld [vmem:[%s2590_s7 + $0x88] sm:$0xf0] }
  0xb9   :  { %v1528_v34 = vor.u32 %v1697_v28, %v1525_v30 }
  0xbb   :  { %1013 = vmatpush.bf16.msrb.mxu1 %v1564_v37  ;;  %1039 = vmatpush.bf16.msrb.mxu3 %v1568_v40  ;;  %v327_v37 = vperm.slane %v324_v25, 1 }
  0xbc   :  { %1002 = vmatpush.bf16.msrb.mxu0 %v1484_v44  ;;  %1028 = vmatpush.bf16.msrb.mxu2 %v1488_v46 }
  0xbf   :  { %1014 = vmatpush.bf16.msrb.mxu1 %v1556_v50  ;;  %1040 = vmatpush.bf16.msrb.mxu3 %v1560_v52  ;;  %v578_v52 = vld [vmem:[%s2592_s6] sm:$0x3] }
  0xc0   :  { %1003 = vmatpush.bf16.msrb.mxu0 %v1476_v56  ;;  %1029 = vmatpush.bf16.msrb.mxu2 %v1480_v58  ;;  %v580_v54 = vperm.slane %v578_v52, 0  ;;  %v581_v59 = vperm.slane %v578_v52, 1 }
  0xc3   :  { %1015 = vmatpush.bf16.msrb.mxu1 %v1548_v62  ;;  %1041 = vmatpush.bf16.msrb.mxu3 %v1552_v0 }
  0xc4   :  { %1004 = vmatpush.bf16.msrb.mxu0 %v1468_v4  ;;  %1030 = vmatpush.bf16.msrb.mxu2 %v1472_v8 }
  0xc7   :  { %1016 = vmatpush.bf16.msrb.mxu1 %v1540_v9  ;;  %1042 = vmatpush.bf16.msrb.mxu3 %v1544_v13  ;;  %v834_v9 = vperm.slane %v832_v5, 0 }
  0xc8   :  { %1005 = vmatpush.bf16.msrb.mxu0 %v1460_v17  ;;  %1031 = vmatpush.bf16.msrb.mxu2 %v1464_v18 }
  0xcb   :  { %1017 = vmatpush.bf16.msrb.mxu1 %v1532_v23  ;;  %1043 = vmatpush.bf16.msrb.mxu3 %v1536_v24 }
  0xcf   :  { %1018 = vmatpush.bf16.msrb.mxu1 %v1524_v29  ;;  %1044 = vmatpush.bf16.msrb.mxu3 %v1528_v34 }
 0x126   :  { %v499_v33 = vpop.f32.mrf.mxu0 }
 0x127   :  { %v500_v35 = vadd.f32 %v499_v33, %v326_v32 }
 0x12c   :  { %v525_v38 = vpop.f32.mrf.mxu2 }
 0x12d   :  { %v526_v43 = vadd.f32 %v525_v38, %v327_v37 }
 0x12e   :  { %v501_v41 = vpop.f32.mrf.mxu0 }
 0x12f   :  { %v512_v39 = vpop.f32.mrf.mxu1 }
 0x130   :  { %v513_v40 = vadd.f32 %v512_v39, %v500_v35 }
 0x132   :  { %v542_v42 = vmax.f32 %v513_v40, 0.0 }
 0x134   :  { %v544_v44 = vpack.c.bf16 %v542_v42, %v542_v42  ;;  %v527_v47 = vpop.f32.mrf.mxu2 }
 0x135   :  { %v538_v45 = vpop.f32.mrf.mxu3 }
 0x136   :  { %v539_v46 = vadd.f32 %v538_v45, %v526_v43  ;;  %752 = vmatmul.bf16.vlgmr.msra.gmra.mxu0 %v544_v44  ;;  %778 = vmatmul.bf16.vlgmr.msra.gmra.mxu2 %v544_v44 }
 0x137   :  { %v514_v48 = vpop.f32.mrf.mxu1 }
 0x138   :  { %v543_v49 = vmax.f32 %v539_v46, 0.0 }
 0x13a   :  { %v545_v50 = vpack.c.bf16 %v543_v49, %v543_v49 }
 0x13c   :  { %765 = vmatmul.bf16.vlgmr.msra.gmra.mxu1 %v545_v50  ;;  %791 = vmatmul.bf16.vlgmr.msra.gmra.mxu3 %v545_v50 }
 0x13d   :  { %v540_v51 = vpop.f32.mrf.mxu3 }
 0x146   :  { %1006 = vmatmul.bf16.vlgmr.msrb.gmra.mxu0 %v544_v44  ;;  %1032 = vmatmul.bf16.vlgmr.msrb.gmra.mxu2 %v544_v44 }
 0x14c   :  { %1019 = vmatmul.bf16.vlgmr.msrb.gmra.mxu1 %v545_v50  ;;  %1045 = vmatmul.bf16.vlgmr.msrb.gmra.mxu3 %v545_v50 }
 0x1b3   :  { %v753_v53 = vpop.f32.mrf.mxu0 }
 0x1b4   :  { %v754_v55 = vadd.f32 %v753_v53, %v580_v54 }
 0x1b9   :  { %v766_v56 = vpop.f32.mrf.mxu1  ;;  %v779_v57 = vpop.f32.mrf.mxu2 }
 0x1ba   :  { %v767_v58 = vadd.f32 %v766_v56, %v754_v55  ;;  %v780_v61 = vadd.f32 %v779_v57, %v581_v59 }
 0x1bb   :  { %v755_v60 = vpop.f32.mrf.mxu0 }
 0x1bc   :  { %1713 = vtanh.f32 %v767_v58 }
 0x1bf   :  { %v792_v62 = vpop.f32.mrf.mxu3 }
 0x1c0   :  { %v793_v63 = vadd.f32 %v792_v62, %v780_v61 }
 0x1c1   :  { %v768_v0 = vpop.f32.mrf.mxu1  ;;  %v781_v1 = vpop.f32.mrf.mxu2 }
 0x1c2   :  { %v1714_v2 = vpop.eup %1713  ;;  %1715 = vtanh.f32 %v793_v63 }
 0x1c3   :  { %v1007_v3 = vpop.f32.mrf.mxu0  ;;  %v798_v4 = vmul.f32 0.5, %v1714_v2 }
 0x1c4   :  { %v1008_v16 = vadd.f32 %v1007_v3, %v834_v9 }
 0x1c5   :  { %v1050_v6 = vmul.f32 1.442695, %v798_v4 }
 0x1c7   :  { %v794_v7 = vpop.f32.mrf.mxu3  ;;  %1717 = vpow2.f32 %v1050_v6 }
 0x1c8   :  { %v1716_v8 = vpop.eup %1715 }
 0x1c9   :  { %v1020_v10 = vpop.f32.mrf.mxu1  ;;  %v1033_v11 = vpop.f32.mrf.mxu2  ;;  %v799_v12 = vmul.f32 0.5, %v1716_v8 }
 0x1ca   :  { %v1021_v18 = vadd.f32 %v1020_v10, %v1008_v16  ;;  %v1034_v25 = vadd.f32 %v1033_v11, %v835_v19 }
 0x1cb   :  { %v1009_v13 = vpop.f32.mrf.mxu0  ;;  %v1052_v14 = vmul.f32 1.442695, %v799_v12  ;;  %v1060_v15 = vadd.f32 %v799_v12, %v798_v4 }
 0x1cd   :  { %v1718_v17 = vpop.eup %1717  ;;  %1719 = vpow2.f32 %v1052_v14  ;;  %1061 = vadd.xlane.f32.xlu0 %v1060_v15 }
 0x1ce   :  { %v1054_v20 = vmul.f32 %v1718_v17, %v1977_v31 }
 0x1cf   :  { %v1046_v21 = vpop.f32.mrf.mxu3 }
 0x1d0   :  { %v1056_v22 = vadd.f32 %v1054_v20, %v1021_v18  ;;  %v1047_v27 = vadd.f32 %v1046_v21, %v1034_v25 }
 0x1d1   :  { %v1022_v23 = vpop.f32.mrf.mxu1  ;;  %v1035_v24 = vpop.f32.mrf.mxu2 }
 0x1d2   :  { %1058 = vst [vmem:[%s2594_s9] sm:$0xff] %v1056_v22 }
 0x1d3   :  { %v1720_v26 = vpop.eup %1719 }
 0x1d4   :  { %v1055_v28 = vmul.f32 %v1720_v26, %v1988_v36 }
 0x1d6   :  { %v1057_v29 = vadd.f32 %v1055_v28, %v1047_v27 }
 0x1d7   :  { %v1048_v30 = vpop.f32.mrf.mxu3 }
 0x1d8   :  { %1059 = vst [vmem:[%s2594_s9 + $0x8] sm:$0xff] %v1057_v29 }
 0x240   :  { %v1062_v31 = vpop.xlane.xlu0 %1061 }
 0x241   :  { %1064 = vst.msk [vmem:[%s2595_s10] sm:$0xff] %vm1063_vm0, %v1062_v31 }

// kernel: _affine_coupling_fwd.1
= control target key start
LH: loop header
LB: loop body
LE: loop exit
PB: predicated region body
PF: predicated region fallthrough
CT: control target
= control target key end

     0   :  { %vm1063_vm0 = vcmask 7168   ;;  %s2585_s1 = inlined_call_operand.vmem [shape: bf16[256,256], index: 1, kind: input, shape index: {}]   ;;  %s2586_s3 = inlined_call_operand.vmem [shape: bf16[256,256], index: 3, kind: input, shape index: {}]   ;;  %s2587_s0 = inlined_call_operand.vmem [shape: f32[8,256], index: 0, kind: input, shape index: {}]   ;;  %s2588_s5 = inlined_call_operand.vmem [shape: bf16[256,256], index: 5, kind: input, shape index: {}]   ;;  %s2589_s2 = inlined_call_operand.vmem [shape: f32[1,256], index: 2, kind: input, shape index: {}]   ;;  %s2590_s7 = inlined_call_operand.vmem [shape: bf16[256,256], index: 7, kind: input, shape index: {}]   ;;  %s2591_s4 = inlined_call_operand.vmem [shape: f32[1,256], index: 4, kind: input, shape index: {}]   ;;  %s2592_s6 = inlined_call_operand.vmem [shape: f32[1,256], index: 6, kind: input, shape index: {}]   ;;  %s2593_s8 = inlined_call_operand.vmem [shape: f32[1,256], index: 8, kind: input, shape index: {}]   ;;  %s2594_s9 = inlined_call_operand.vmem [shape: f32[8,256], index: 9, kind: output, shape index: {0}]   ;;  %s2595_s10 = inlined_call_operand.vmem [shape: f32[8,1], index: 10, kind: output, shape index: {1}]  }
   0x1   :  { %v1131_v0 = vld [vmem:[%s2585_s1 + $0x70] sm:$0xf]  ;;  %v1600_v1 = vld [vmem:[%s2585_s1 + $0x74] sm:$0xf0]  ;;  %v1599_v5 = vld [vmem:[%s2585_s1 + $0x74] sm:$0xf] }
   0x2   :  { %v1195_v2 = vld [vmem:[%s2585_s1 + $0xf0] sm:$0xf]  ;;  %v1132_v3 = vor.u32 %v1600_v1, %v1131_v0  ;;  %v1616_v4 = vld [vmem:[%s2585_s1 + $0xf4] sm:$0xf0]  ;;  %v1133_v6 = vld [vmem:[%s2585_s1 + $0x78] sm:$0xf0] }
   0x3   :  { %v1196_v7 = vor.u32 %v1616_v4, %v1195_v2  ;;  %v1136_v8 = vor.u32 %v1599_v5, %v1133_v6  ;;  %v1615_v9 = vld [vmem:[%s2585_s1 + $0xf4] sm:$0xf]  ;;  %v1197_v10 = vld [vmem:[%s2585_s1 + $0xf8] sm:$0xf0]  ;;  %v1123_v11 = vld [vmem:[%s2585_s1 + $0x60] sm:$0xf] }
   0x4   :  { %236 = vmatpush.bf16.msra.mxu0 %v1132_v3  ;;  %v1200_v12 = vor.u32 %v1615_v9, %v1197_v10  ;;  %v1598_v13 = vld [vmem:[%s2585_s1 + $0x64] sm:$0xf0]  ;;  %v1187_v14 = vld [vmem:[%s2585_s1 + $0xe0] sm:$0xf]  ;;  %v1597_v18 = vld [vmem:[%s2585_s1 + $0x64] sm:$0xf] }
   0x5   :  { %v1614_v15 = vld [vmem:[%s2585_s1 + $0xe4] sm:$0xf0]  ;;  %249 = vmatpush.bf16.msra.mxu1 %v1196_v7  ;;  %262 = vmatpush.bf16.msra.mxu2 %v1136_v8  ;;  %v1124_v16 = vor.u32 %v1598_v13, %v1123_v11  ;;  %v1125_v19 = vld [vmem:[%s2585_s1 + $0x68] sm:$0xf0]  ;;  %v1613_v20 = vld [vmem:[%s2585_s1 + $0xe4] sm:$0xf] }
   0x6   :  { %v1188_v17 = vor.u32 %v1614_v15, %v1187_v14  ;;  %275 = vmatpush.bf16.msra.mxu3 %v1200_v12  ;;  %v1128_v21 = vor.u32 %v1597_v18, %v1125_v19  ;;  %v1189_v22 = vld [vmem:[%s2585_s1 + $0xe8] sm:$0xf0]  ;;  %v1115_v23 = vld [vmem:[%s2585_s1 + $0x50] sm:$0xf]  ;;  %v1596_v24 = vld [vmem:[%s2585_s1 + $0x54] sm:$0xf0] }
   0x7   :  { %v1192_v25 = vor.u32 %v1613_v20, %v1189_v22  ;;  %v1179_v26 = vld [vmem:[%s2585_s1 + $0xd0] sm:$0xf]  ;;  %v1612_v27 = vld [vmem:[%s2585_s1 + $0xd4] sm:$0xf0]  ;;  %v1595_v28 = vld [vmem:[%s2585_s1 + $0x54] sm:$0xf]  ;;  %v1116_v29 = vor.u32 %v1596_v24, %v1115_v23 }
   0x8   :  { %237 = vmatpush.bf16.msra.mxu0 %v1124_v16  ;;  %v1117_v30 = vld [vmem:[%s2585_s1 + $0x58] sm:$0xf0]  ;;  %v1611_v31 = vld [vmem:[%s2585_s1 + $0xd4] sm:$0xf]  ;;  %v1180_v33 = vor.u32 %v1612_v27, %v1179_v26  ;;  %v1107_v35 = vld [vmem:[%s2585_s1 + $0x40] sm:$0xf] }
   0x9   :  { %v1181_v32 = vld [vmem:[%s2585_s1 + $0xd8] sm:$0xf0]  ;;  %250 = vmatpush.bf16.msra.mxu1 %v1188_v17  ;;  %263 = vmatpush.bf16.msra.mxu2 %v1128_v21  ;;  %v1120_v34 = vor.u32 %v1595_v28, %v1117_v30  ;;  %v1594_v36 = vld [vmem:[%s2585_s1 + $0x44] sm:$0xf0]  ;;  %v1171_v37 = vld [vmem:[%s2585_s1 + $0xc0] sm:$0xf] }
   0xa   :  { %276 = vmatpush.bf16.msra.mxu3 %v1192_v25  ;;  %v1184_v38 = vor.u32 %v1611_v31, %v1181_v32  ;;  %v1610_v39 = vld [vmem:[%s2585_s1 + $0xc4] sm:$0xf0]  ;;  %v1593_v40 = vld [vmem:[%s2585_s1 + $0x44] sm:$0xf]  ;;  %v1109_v41 = vld [vmem:[%s2585_s1 + $0x48] sm:$0xf0]  ;;  %v1108_v44 = vor.u32 %v1594_v36, %v1107_v35 }
   0xb   :  { %v1609_v42 = vld [vmem:[%s2585_s1 + $0xc4] sm:$0xf]  ;;  %v1173_v43 = vld [vmem:[%s2585_s1 + $0xc8] sm:$0xf0]  ;;  %v1172_v45 = vor.u32 %v1610_v39, %v1171_v37  ;;  %v1112_v46 = vor.u32 %v1593_v40, %v1109_v41  ;;  %v1099_v47 = vld [vmem:[%s2585_s1 + $0x30] sm:$0xf] }
   0xc   :  { %238 = vmatpush.bf16.msra.mxu0 %v1116_v29  ;;  %v1592_v48 = vld [vmem:[%s2585_s1 + $0x34] sm:$0xf0]  ;;  %v1163_v49 = vld [vmem:[%s2585_s1 + $0xb0] sm:$0xf]  ;;  %v1176_v50 = vor.u32 %v1609_v42, %v1173_v43  ;;  %v1591_v52 = vld [vmem:[%s2585_s1 + $0x34] sm:$0xf] }
   0xd   :  { %251 = vmatpush.bf16.msra.mxu1 %v1180_v33  ;;  %264 = vmatpush.bf16.msra.mxu2 %v1120_v34  ;;  %v1608_v51 = vld [vmem:[%s2585_s1 + $0xb4] sm:$0xf0]  ;;  %v1101_v53 = vld [vmem:[%s2585_s1 + $0x38] sm:$0xf0]  ;;  %v1607_v54 = vld [vmem:[%s2585_s1 + $0xb4] sm:$0xf]  ;;  %v1100_v56 = vor.u32 %v1592_v48, %v1099_v47 }
   0xe   :  { %277 = vmatpush.bf16.msra.mxu3 %v1184_v38  ;;  %v1165_v55 = vld [vmem:[%s2585_s1 + $0xb8] sm:$0xf0]  ;;  %v1164_v57 = vor.u32 %v1608_v51, %v1163_v49  ;;  %v1104_v58 = vor.u32 %v1591_v52, %v1101_v53  ;;  %v1091_v59 = vld [vmem:[%s2585_s1 + $0x20] sm:$0xf]  ;;  %v1590_v60 = vld [vmem:[%s2585_s1 + $0x24] sm:$0xf0] }
   0xf   :  { %v1155_v61 = vld [vmem:[%s2585_s1 + $0xa0] sm:$0xf]  ;;  %v1168_v62 = vor.u32 %v1607_v54, %v1165_v55  ;;  %v1606_v63 = vld [vmem:[%s2585_s1 + $0xa4] sm:$0xf0]  ;;  %v1589_v0 = vld [vmem:[%s2585_s1 + $0x24] sm:$0xf]  ;;  %v1092_v4 = vor.u32 %v1590_v60, %v1091_v59 }
  0x10   :  { %239 = vmatpush.bf16.msra.mxu0 %v1108_v44  ;;  %v1093_v1 = vld [vmem:[%s2585_s1 + $0x28] sm:$0xf0]  ;;  %v1605_v2 = vld [vmem:[%s2585_s1 + $0xa4] sm:$0xf]  ;;  %v1156_v5 = vor.u32 %v1606_v63, %v1155_v61  ;;  %v1083_v7 = vld [vmem:[%s2585_s1 + $0x10] sm:$0xf] }
  0x11   :  { %252 = vmatpush.bf16.msra.mxu1 %v1172_v45  ;;  %265 = vmatpush.bf16.msra.mxu2 %v1112_v46  ;;  %v1157_v3 = vld [vmem:[%s2585_s1 + $0xa8] sm:$0xf0]  ;;  %v1096_v6 = vor.u32 %v1589_v0, %v1093_v1  ;;  %v1588_v8 = vld [vmem:[%s2585_s1 + $0x14] sm:$0xf0]  ;;  %v1147_v9 = vld [vmem:[%s2585_s1 + $0x90] sm:$0xf] }
  0x12   :  { %278 = vmatpush.bf16.msra.mxu3 %v1176_v50  ;;  %v1160_v10 = vor.u32 %v1605_v2, %v1157_v3  ;;  %v1604_v11 = vld [vmem:[%s2585_s1 + $0x94] sm:$0xf0]  ;;  %v1587_v12 = vld [vmem:[%s2585_s1 + $0x14] sm:$0xf]  ;;  %v1085_v13 = vld [vmem:[%s2585_s1 + $0x18] sm:$0xf0]  ;;  %v1084_v16 = vor.u32 %v1588_v8, %v1083_v7 }
  0x13   :  { %v1603_v14 = vld [vmem:[%s2585_s1 + $0x94] sm:$0xf]  ;;  %v1149_v15 = vld [vmem:[%s2585_s1 + $0x98] sm:$0xf0]  ;;  %v1075_v17 = vld [vmem:[%s2585_s1] sm:$0xf]  ;;  %v1148_v18 = vor.u32 %v1604_v11, %v1147_v9  ;;  %v1088_v19 = vor.u32 %v1587_v12, %v1085_v13 }
  0x14   :  { %240 = vmatpush.bf16.msra.mxu0 %v1100_v56  ;;  %v1586_v20 = vld [vmem:[%s2585_s1 + $0x4] sm:$0xf0]  ;;  %v1139_v21 = vld [vmem:[%s2585_s1 + $0x80] sm:$0xf]  ;;  %v1152_v23 = vor.u32 %v1603_v14, %v1149_v15  ;;  %v1585_v24 = vld [vmem:[%s2585_s1 + $0x4] sm:$0xf] }
  0x15   :  { %253 = vmatpush.bf16.msra.mxu1 %v1164_v57  ;;  %266 = vmatpush.bf16.msra.mxu2 %v1104_v58  ;;  %v1602_v22 = vld [vmem:[%s2585_s1 + $0x84] sm:$0xf0]  ;;  %v1077_v25 = vld [vmem:[%s2585_s1 + $0x8] sm:$0xf0]  ;;  %v1601_v26 = vld [vmem:[%s2585_s1 + $0x84] sm:$0xf]  ;;  %v1076_v30 = vor.u32 %v1586_v20, %v1075_v17 }
  0x16   :  { %279 = vmatpush.bf16.msra.mxu3 %v1168_v62  ;;  %v1141_v27 = vld [vmem:[%s2585_s1 + $0x88] sm:$0xf0]  ;;  %v1259_v28 = vld [vmem:[%s2586_s3 + $0x70] sm:$0xf]  ;;  %v1632_v29 = vld [vmem:[%s2586_s3 + $0x74] sm:$0xf0]  ;;  %v1140_v34 = vor.u32 %v1602_v22, %v1139_v21  ;;  %v1080_v35 = vor.u32 %v1585_v24, %v1077_v25 }
  0x17   :  { %v1977_v31 = vld [vmem:[%s2587_s0] sm:$0xff]  ;;  %v1631_v32 = vld [vmem:[%s2586_s3 + $0x74] sm:$0xf]  ;;  %v1261_v33 = vld [vmem:[%s2586_s3 + $0x78] sm:$0xf0]  ;;  %v1144_v37 = vor.u32 %v1601_v26, %v1141_v27  ;;  %v1260_v38 = vor.u32 %v1632_v29, %v1259_v28 }
  0x18   :  { %241 = vmatpush.bf16.msra.mxu0 %v1092_v4  ;;  %v1988_v36 = vld [vmem:[%s2587_s0 + $0x8] sm:$0xff]  ;;  %v1251_v39 = vld [vmem:[%s2586_s3 + $0x60] sm:$0xf]  ;;  %v1323_v40 = vld [vmem:[%s2586_s3 + $0xf0] sm:$0xf]  ;;  %v36_v42 = vpack.c.bf16 %v1977_v31, %v1977_v31  ;;  %v1264_v43 = vor.u32 %v1631_v32, %v1261_v33 }
  0x19   :  { %254 = vmatpush.bf16.msra.mxu1 %v1156_v5  ;;  %267 = vmatpush.bf16.msra.mxu2 %v1096_v6  ;;  %v1648_v41 = vld [vmem:[%s2586_s3 + $0xf4] sm:$0xf0]  ;;  %v1630_v44 = vld [vmem:[%s2586_s3 + $0x64] sm:$0xf0]  ;;  %v1647_v45 = vld [vmem:[%s2586_s3 + $0xf4] sm:$0xf]  ;;  %v37_v47 = vpack.c.bf16 %v1988_v36, %v1988_v36 }
  0x1a   :  { %280 = vmatpush.bf16.msra.mxu3 %v1160_v10  ;;  %v1325_v46 = vld [vmem:[%s2586_s3 + $0xf8] sm:$0xf0]  ;;  %v1629_v48 = vld [vmem:[%s2586_s3 + $0x64] sm:$0xf]  ;;  %v1253_v49 = vld [vmem:[%s2586_s3 + $0x68] sm:$0xf0]  ;;  %v1324_v50 = vor.u32 %v1648_v41, %v1323_v40  ;;  %v1252_v51 = vor.u32 %v1630_v44, %v1251_v39 }
  0x1b   :  { %v1328_v52 = vor.u32 %v1647_v45, %v1325_v46  ;;  %v1243_v53 = vld [vmem:[%s2586_s3 + $0x50] sm:$0xf]  ;;  %v1315_v54 = vld [vmem:[%s2586_s3 + $0xe0] sm:$0xf]  ;;  %v1646_v55 = vld [vmem:[%s2586_s3 + $0xe4] sm:$0xf0]  ;;  %v1256_v56 = vor.u32 %v1629_v48, %v1253_v49 }
  0x1c   :  { %242 = vmatpush.bf16.msra.mxu0 %v1084_v16  ;;  %v1628_v57 = vld [vmem:[%s2586_s3 + $0x54] sm:$0xf0]  ;;  %v1645_v58 = vld [vmem:[%s2586_s3 + $0xe4] sm:$0xf]  ;;  %v1317_v59 = vld [vmem:[%s2586_s3 + $0xe8] sm:$0xf0]  ;;  %v1316_v62 = vor.u32 %v1646_v55, %v1315_v54 }
  0x1d   :  { %255 = vmatpush.bf16.msra.mxu1 %v1148_v18  ;;  %268 = vmatpush.bf16.msra.mxu2 %v1088_v19  ;;  %v1627_v60 = vld [vmem:[%s2586_s3 + $0x54] sm:$0xf]  ;;  %v1245_v61 = vld [vmem:[%s2586_s3 + $0x58] sm:$0xf0]  ;;  %v1244_v63 = vor.u32 %v1628_v57, %v1243_v53  ;;  %v1320_v0 = vor.u32 %v1645_v58, %v1317_v59  ;;  %v1235_v1 = vld [vmem:[%s2586_s3 + $0x40] sm:$0xf] }
  0x1e   :  { %281 = vmatpush.bf16.msra.mxu3 %v1152_v23  ;;  %v1307_v2 = vld [vmem:[%s2586_s3 + $0xd0] sm:$0xf]  ;;  %v1644_v3 = vld [vmem:[%s2586_s3 + $0xd4] sm:$0xf0]  ;;  %v1248_v4 = vor.u32 %v1627_v60, %v1245_v61  ;;  %v1626_v5 = vld [vmem:[%s2586_s3 + $0x44] sm:$0xf0] }
  0x1f   :  { %v1643_v6 = vld [vmem:[%s2586_s3 + $0xd4] sm:$0xf]  ;;  %v1309_v7 = vld [vmem:[%s2586_s3 + $0xd8] sm:$0xf0]  ;;  %v1625_v8 = vld [vmem:[%s2586_s3 + $0x44] sm:$0xf]  ;;  %v1308_v10 = vor.u32 %v1644_v3, %v1307_v2  ;;  %v1236_v11 = vor.u32 %v1626_v5, %v1235_v1 }
  0x20   :  { %243 = vmatpush.bf16.msra.mxu0 %v1076_v30  ;;  %v1237_v9 = vld [vmem:[%s2586_s3 + $0x48] sm:$0xf0]  ;;  %v1312_v12 = vor.u32 %v1643_v6, %v1309_v7  ;;  %v1227_v13 = vld [vmem:[%s2586_s3 + $0x30] sm:$0xf]  ;;  %v1299_v14 = vld [vmem:[%s2586_s3 + $0xc0] sm:$0xf] }
  0x21   :  { %256 = vmatpush.bf16.msra.mxu1 %v1140_v34  ;;  %269 = vmatpush.bf16.msra.mxu2 %v1080_v35  ;;  %v1642_v15 = vld [vmem:[%s2586_s3 + $0xc4] sm:$0xf0]  ;;  %v1240_v16 = vor.u32 %v1625_v8, %v1237_v9  ;;  %v1624_v17 = vld [vmem:[%s2586_s3 + $0x34] sm:$0xf0]  ;;  %v1641_v18 = vld [vmem:[%s2586_s3 + $0xc4] sm:$0xf] }
  0x22   :  { %282 = vmatpush.bf16.msra.mxu3 %v1144_v37  ;;  %v1301_v19 = vld [vmem:[%s2586_s3 + $0xc8] sm:$0xf0]  ;;  %v1623_v20 = vld [vmem:[%s2586_s3 + $0x34] sm:$0xf]  ;;  %v1229_v21 = vld [vmem:[%s2586_s3 + $0x38] sm:$0xf0]  ;;  %v1300_v22 = vor.u32 %v1642_v15, %v1299_v14  ;;  %v1228_v23 = vor.u32 %v1624_v17, %v1227_v13 }
  0x23   :  { %244 = vmatmul.bf16.vlgmr.msra.gmra.mxu0 %v36_v42  ;;  %v1304_v24 = vor.u32 %v1641_v18, %v1301_v19  ;;  %v1232_v25 = vor.u32 %v1623_v20, %v1229_v21  ;;  %v1219_v26 = vld [vmem:[%s2586_s3 + $0x20] sm:$0xf]  ;;  %v1622_v27 = vld [vmem:[%s2586_s3 + $0x24] sm:$0xf0]  ;;  %v1621_v28 = vld [vmem:[%s2586_s3 + $0x24] sm:$0xf] }
  0x24   :  { %490 = vmatpush.bf16.msrb.mxu0 %v1260_v38  ;;  %257 = vmatmul.bf16.vlgmr.msra.gmra.mxu1 %v37_v47  ;;  %v1221_v29 = vld [vmem:[%s2586_s3 + $0x28] sm:$0xf0]  ;;  %v1220_v30 = vor.u32 %v1622_v27, %v1219_v26  ;;  %v1291_v33 = vld [vmem:[%s2586_s3 + $0xb0] sm:$0xf]  ;;  %v1640_v34 = vld [vmem:[%s2586_s3 + $0xb4] sm:$0xf0] }
  0x25   :  { %516 = vmatpush.bf16.msrb.mxu2 %v1264_v43  ;;  %283 = vmatmul.bf16.vlgmr.msra.gmra.mxu3 %v37_v47  ;;  %v1224_v32 = vor.u32 %v1621_v28, %v1221_v29  ;;  %v1639_v35 = vld [vmem:[%s2586_s3 + $0xb4] sm:$0xf]  ;;  %v1292_v37 = vor.u32 %v1640_v34, %v1291_v33  ;;  %v1293_v38 = vld [vmem:[%s2586_s3 + $0xb8] sm:$0xf0]  ;;  %v1211_v40 = vld [vmem:[%s2586_s3 + $0x10] sm:$0xf] }
  0x26   :  { %270 = vmatmul.bf16.vlgmr.msra.gmra.mxu2 %v36_v42  ;;  %503 = vmatpush.bf16.msrb.mxu1 %v1324_v50  ;;  %v1296_v39 = vor.u32 %v1639_v35, %v1293_v38  ;;  %v1620_v41 = vld [vmem:[%s2586_s3 + $0x14] sm:$0xf0]  ;;  %v1619_v42 = vld [vmem:[%s2586_s3 + $0x14] sm:$0xf]  ;;  %v1213_v44 = vld [vmem:[%s2586_s3 + $0x18] sm:$0xf0] }
  0x27   :  { %529 = vmatpush.bf16.msrb.mxu3 %v1328_v52  ;;  %v1212_v43 = vor.u32 %v1620_v41, %v1211_v40  ;;  %v1216_v45 = vor.u32 %v1619_v42, %v1213_v44  ;;  %v1283_v46 = vld [vmem:[%s2586_s3 + $0xa0] sm:$0xf]  ;;  %v1638_v47 = vld [vmem:[%s2586_s3 + $0xa4] sm:$0xf0]  ;;  %v1637_v48 = vld [vmem:[%s2586_s3 + $0xa4] sm:$0xf] }
  0x28   :  { %491 = vmatpush.bf16.msrb.mxu0 %v1252_v51  ;;  %v1284_v49 = vor.u32 %v1638_v47, %v1283_v46  ;;  %v1285_v50 = vld [vmem:[%s2586_s3 + $0xa8] sm:$0xf0]  ;;  %v1203_v52 = vld [vmem:[%s2586_s3] sm:$0xf]  ;;  %v1618_v53 = vld [vmem:[%s2586_s3 + $0x4] sm:$0xf0] }
  0x29   :  { %517 = vmatpush.bf16.msrb.mxu2 %v1256_v56  ;;  %v1288_v51 = vor.u32 %v1637_v48, %v1285_v50  ;;  %v1617_v54 = vld [vmem:[%s2586_s3 + $0x4] sm:$0xf]  ;;  %v1204_v55 = vor.u32 %v1618_v53, %v1203_v52  ;;  %v1205_v56 = vld [vmem:[%s2586_s3 + $0x8] sm:$0xf0]  ;;  %v1275_v58 = vld [vmem:[%s2586_s3 + $0x90] sm:$0xf] }
  0x2a   :  { %504 = vmatpush.bf16.msrb.mxu1 %v1316_v62  ;;  %v1208_v57 = vor.u32 %v1617_v54, %v1205_v56  ;;  %v1636_v59 = vld [vmem:[%s2586_s3 + $0x94] sm:$0xf0]  ;;  %v1635_v61 = vld [vmem:[%s2586_s3 + $0x94] sm:$0xf]  ;;  %v1277_v62 = vld [vmem:[%s2586_s3 + $0x98] sm:$0xf0] }
  0x2b   :  { %530 = vmatpush.bf16.msrb.mxu3 %v1320_v0  ;;  %v1276_v60 = vor.u32 %v1636_v59, %v1275_v58  ;;  %v1267_v0 = vld [vmem:[%s2586_s3 + $0x80] sm:$0xf]  ;;  %v1634_v1 = vld [vmem:[%s2586_s3 + $0x84] sm:$0xf0]  ;;  %v1633_v2 = vld [vmem:[%s2586_s3 + $0x84] sm:$0xf] }
  0x2c   :  { %492 = vmatpush.bf16.msrb.mxu0 %v1244_v63  ;;  %v1280_v63 = vor.u32 %v1635_v61, %v1277_v62  ;;  %v1268_v3 = vor.u32 %v1634_v1, %v1267_v0  ;;  %v1387_v6 = vld [vmem:[%s2588_s5 + $0x70] sm:$0xf]  ;;  %v1664_v7 = vld [vmem:[%s2588_s5 + $0x74] sm:$0xf0]  ;;  %v1663_v8 = vld [vmem:[%s2588_s5 + $0x74] sm:$0xf] }
  0x2d   :  { %518 = vmatpush.bf16.msrb.mxu2 %v1248_v4  ;;  %v1269_v4 = vld [vmem:[%s2586_s3 + $0x88] sm:$0xf0]  ;;  %v1388_v9 = vor.u32 %v1664_v7, %v1387_v6  ;;  %v1661_v14 = vld [vmem:[%s2588_s5 + $0x64] sm:$0xf]  ;;  %v1680_v18 = vld [vmem:[%s2588_s5 + $0xf4] sm:$0xf0] }
  0x2e   :  { %505 = vmatpush.bf16.msrb.mxu1 %v1308_v10  ;;  %v1272_v5 = vor.u32 %v1633_v2, %v1269_v4  ;;  %v1389_v10 = vld [vmem:[%s2588_s5 + $0x78] sm:$0xf0]  ;;  %v1381_v15 = vld [vmem:[%s2588_s5 + $0x68] sm:$0xf0]  ;;  %v1679_v19 = vld [vmem:[%s2588_s5 + $0xf4] sm:$0xf] }
  0x2f   :  { %531 = vmatpush.bf16.msrb.mxu3 %v1312_v12  ;;  %v1662_v12 = vld [vmem:[%s2588_s5 + $0x64] sm:$0xf0]  ;;  %v1392_v13 = vor.u32 %v1663_v8, %v1389_v10  ;;  %v1453_v20 = vld [vmem:[%s2588_s5 + $0xf8] sm:$0xf0]  ;;  %v1384_v21 = vor.u32 %v1661_v14, %v1381_v15  ;;  %v1659_v26 = vld [vmem:[%s2588_s5 + $0x54] sm:$0xf] }
  0x30   :  { %493 = vmatpush.bf16.msrb.mxu0 %v1236_v11  ;;  %v1379_v11 = vld [vmem:[%s2588_s5 + $0x60] sm:$0xf]  ;;  %v1373_v27 = vld [vmem:[%s2588_s5 + $0x58] sm:$0xf0]  ;;  %v1678_v29 = vld [vmem:[%s2588_s5 + $0xe4] sm:$0xf0] }
  0x31   :  { %519 = vmatpush.bf16.msrb.mxu2 %v1240_v16  ;;  %v1451_v16 = vld [vmem:[%s2588_s5 + $0xf0] sm:$0xf]  ;;  %v1380_v17 = vor.u32 %v1662_v12, %v1379_v11  ;;  %v1443_v28 = vld [vmem:[%s2588_s5 + $0xe0] sm:$0xf]  ;;  %v1445_v33 = vld [vmem:[%s2588_s5 + $0xe8] sm:$0xf0] }
  0x32   :  { %506 = vmatpush.bf16.msrb.mxu1 %v1300_v22  ;;  %v1452_v22 = vor.u32 %v1680_v18, %v1451_v16  ;;  %v1658_v38 = vld [vmem:[%s2588_s5 + $0x44] sm:$0xf0]  ;;  %v1435_v40 = vld [vmem:[%s2588_s5 + $0xd0] sm:$0xf]  ;;  %v1676_v41 = vld [vmem:[%s2588_s5 + $0xd4] sm:$0xf0] }
  0x33   :  { %532 = vmatpush.bf16.msrb.mxu3 %v1304_v24  ;;  %v1371_v24 = vld [vmem:[%s2588_s5 + $0x50] sm:$0xf]  ;;  %v1675_v42 = vld [vmem:[%s2588_s5 + $0xd4] sm:$0xf]  ;;  %v1365_v44 = vld [vmem:[%s2588_s5 + $0x48] sm:$0xf0]  ;;  %v1436_v47 = vor.u32 %v1676_v41, %v1435_v40 }
  0x34   :  { %494 = vmatpush.bf16.msrb.mxu0 %v1228_v23  ;;  %v1456_v23 = vor.u32 %v1679_v19, %v1453_v20  ;;  %v2261_v46 = vld [vmem:[%s2589_s2] sm:$0x3]  ;;  %v1673_v52 = vld [vmem:[%s2588_s5 + $0xc4] sm:$0xf]  ;;  %v1429_v53 = vld [vmem:[%s2588_s5 + $0xc8] sm:$0xf0] }
  0x35   :  { %520 = vmatpush.bf16.msrb.mxu2 %v1232_v25  ;;  %v1660_v25 = vld [vmem:[%s2588_s5 + $0x54] sm:$0xf0]  ;;  %v1655_v58 = vld [vmem:[%s2588_s5 + $0x34] sm:$0xf]  ;;  %v1357_v59 = vld [vmem:[%s2588_s5 + $0x38] sm:$0xf0]  ;;  %v1432_v61 = vor.u32 %v1673_v52, %v1429_v53 }
  0x36   :  { %507 = vmatpush.bf16.msrb.mxu1 %v1292_v37  ;;  %v1372_v34 = vor.u32 %v1660_v25, %v1371_v24  ;;  %v1363_v37 = vld [vmem:[%s2588_s5 + $0x40] sm:$0xf]  ;;  %v1656_v56 = vld [vmem:[%s2588_s5 + $0x34] sm:$0xf0]  ;;  %v1419_v62 = vld [vmem:[%s2588_s5 + $0xb0] sm:$0xf]  ;;  %v1360_v4 = vor.u32 %v1655_v58, %v1357_v59 }
  0x37   :  { %533 = vmatpush.bf16.msrb.mxu3 %v1296_v39  ;;  %v1376_v39 = vor.u32 %v1659_v26, %v1373_v27  ;;  %v1364_v50 = vor.u32 %v1658_v38, %v1363_v37  ;;  %v1672_v0 = vld [vmem:[%s2588_s5 + $0xb4] sm:$0xf0]  ;;  %v1671_v1 = vld [vmem:[%s2588_s5 + $0xb4] sm:$0xf]  ;;  %v1421_v2 = vld [vmem:[%s2588_s5 + $0xb8] sm:$0xf0] }
  0x38   :  { %495 = vmatpush.bf16.msrb.mxu0 %v1220_v30  ;;  %v1444_v30 = vor.u32 %v1678_v29, %v1443_v28  ;;  %v1654_v6 = vld [vmem:[%s2588_s5 + $0x24] sm:$0xf0]  ;;  %v1349_v10 = vld [vmem:[%s2588_s5 + $0x28] sm:$0xf0]  ;;  %v1420_v11 = vor.u32 %v1672_v0, %v1419_v62  ;;  %v1424_v12 = vor.u32 %v1671_v1, %v1421_v2  ;;  %v73_v19 = vperm.slane %v2261_v46, 1 }
  0x39   :  { %521 = vmatpush.bf16.msrb.mxu2 %v1224_v32  ;;  %v1677_v32 = vld [vmem:[%s2588_s5 + $0xe4] sm:$0xf]  ;;  %v1670_v16 = vld [vmem:[%s2588_s5 + $0xa4] sm:$0xf0]  ;;  %v1413_v18 = vld [vmem:[%s2588_s5 + $0xa8] sm:$0xf0] }
  0x3a   :  { %508 = vmatpush.bf16.msrb.mxu1 %v1284_v49  ;;  %v1448_v35 = vor.u32 %v1677_v32, %v1445_v33  ;;  %v1427_v49 = vld [vmem:[%s2588_s5 + $0xc0] sm:$0xf]  ;;  %v1651_v24 = vld [vmem:[%s2588_s5 + $0x14] sm:$0xf]  ;;  %v1341_v25 = vld [vmem:[%s2588_s5 + $0x18] sm:$0xf0] }
  0x3b   :  { %534 = vmatpush.bf16.msrb.mxu3 %v1288_v51  ;;  %v1674_v51 = vld [vmem:[%s2588_s5 + $0xc4] sm:$0xf0]  ;;  %v1403_v28 = vld [vmem:[%s2588_s5 + $0x90] sm:$0xf]  ;;  %v1668_v33 = vld [vmem:[%s2588_s5 + $0x94] sm:$0xf0]  ;;  %v1344_v40 = vor.u32 %v1651_v24, %v1341_v25 }
  0x3c   :  { %496 = vmatpush.bf16.msrb.mxu0 %v1212_v43  ;;  %v1657_v43 = vld [vmem:[%s2588_s5 + $0x44] sm:$0xf]  ;;  %v1331_v41 = vld [vmem:[%s2588_s5] sm:$0xf]  ;;  %v1695_v52 = vld [vmem:[%s2590_s7 + $0x74] sm:$0xf] }
  0x3d   :  { %522 = vmatpush.bf16.msrb.mxu2 %v1216_v45  ;;  %v1437_v45 = vld [vmem:[%s2588_s5 + $0xd8] sm:$0xf0]  ;;  %v1368_v54 = vor.u32 %v1657_v43, %v1365_v44  ;;  %v1649_v44 = vld [vmem:[%s2588_s5 + $0x4] sm:$0xf]  ;;  %v1694_v62 = vld [vmem:[%s2590_s7 + $0x64] sm:$0xf0] }
  0x3e   :  { %509 = vmatpush.bf16.msrb.mxu1 %v1276_v60  ;;  %v1440_v48 = vor.u32 %v1675_v42, %v1437_v45  ;;  %v1428_v60 = vor.u32 %v1674_v51, %v1427_v49  ;;  %v1650_v42 = vld [vmem:[%s2588_s5 + $0x4] sm:$0xf0]  ;;  %v1404_v49 = vor.u32 %v1668_v33, %v1403_v28  ;;  %v1517_v53 = vld [vmem:[%s2590_s7 + $0x78] sm:$0xf0]  ;;  %v1509_v1 = vld [vmem:[%s2590_s7 + $0x68] sm:$0xf0] }
  0x3f   :  { %535 = vmatpush.bf16.msrb.mxu3 %v1280_v63  ;;  %v1332_v51 = vor.u32 %v1650_v42, %v1331_v41  ;;  %v1520_v58 = vor.u32 %v1695_v52, %v1517_v53  ;;  %v1395_v2 = vld [vmem:[%s2588_s5 + $0x80] sm:$0xf]  ;;  %v1573_v25 = vld [vmem:[%s2590_s7 + $0xe8] sm:$0xf0]  ;;  %v1690_v28 = vld [vmem:[%s2590_s7 + $0x44] sm:$0xf0] }
  0x40   :  { %497 = vmatpush.bf16.msrb.mxu0 %v1204_v55  ;;  %v1355_v55 = vld [vmem:[%s2588_s5 + $0x30] sm:$0xf]  ;;  %v1688_v42 = vld [vmem:[%s2590_s7 + $0x34] sm:$0xf0]  ;;  %v1475_v53 = vld [vmem:[%s2590_s7 + $0x20] sm:$0xf] }
  0x41   :  { %523 = vmatpush.bf16.msrb.mxu2 %v1208_v57  ;;  %v72_v57 = vperm.slane %v2261_v46, 0  ;;  %v1356_v63 = vor.u32 %v1656_v56, %v1355_v55  ;;  %v1333_v46 = vld [vmem:[%s2588_s5 + $0x8] sm:$0xf0]  ;;  %v1483_v41 = vld [vmem:[%s2590_s7 + $0x30] sm:$0xf] }
  0x42   :  { %510 = vmatpush.bf16.msrb.mxu1 %v1268_v3  ;;  %v1336_v55 = vor.u32 %v1649_v44, %v1333_v46  ;;  %v1484_v44 = vor.u32 %v1688_v42, %v1483_v41 }
  0x43   :  { %536 = vmatpush.bf16.msrb.mxu3 %v1272_v5  ;;  %v1347_v5 = vld [vmem:[%s2588_s5 + $0x20] sm:$0xf] }
  0x44   :  { %744 = vmatpush.bf16.msra.mxu0 %v1388_v9  ;;  %v1653_v9 = vld [vmem:[%s2588_s5 + $0x24] sm:$0xf]  ;;  %v1348_v15 = vor.u32 %v1654_v6, %v1347_v5 }
  0x45   :  { %770 = vmatpush.bf16.msra.mxu2 %v1392_v13  ;;  %v1411_v13 = vld [vmem:[%s2588_s5 + $0xa0] sm:$0xf]  ;;  %v1352_v20 = vor.u32 %v1653_v9, %v1349_v10  ;;  %v1665_v6 = vld [vmem:[%s2588_s5 + $0x84] sm:$0xf]  ;;  %v1712_v10 = vld [vmem:[%s2590_s7 + $0xf4] sm:$0xf0] }
  0x46   :  { %757 = vmatpush.bf16.msra.mxu1 %v1452_v22  ;;  %v1652_v22 = vld [vmem:[%s2588_s5 + $0x14] sm:$0xf0]  ;;  %v1412_v26 = vor.u32 %v1670_v16, %v1411_v13 }
  0x47   :  { %783 = vmatpush.bf16.msra.mxu3 %v1456_v23  ;;  %v1692_v16 = vld [vmem:[%s2590_s7 + $0x54] sm:$0xf0] }
  0x48   :  { %745 = vmatpush.bf16.msra.mxu0 %v1380_v17  ;;  %v1669_v17 = vld [vmem:[%s2588_s5 + $0xa4] sm:$0xf] }
  0x49   :  { %771 = vmatpush.bf16.msra.mxu2 %v1384_v21  ;;  %v1339_v21 = vld [vmem:[%s2588_s5 + $0x10] sm:$0xf]  ;;  %v1416_v27 = vor.u32 %v1669_v17, %v1413_v18  ;;  %v1691_v17 = vld [vmem:[%s2590_s7 + $0x54] sm:$0xf] }
  0x4a   :  { %758 = vmatpush.bf16.msra.mxu1 %v1444_v30  ;;  %v1340_v32 = vor.u32 %v1652_v22, %v1339_v21  ;;  %v1571_v21 = vld [vmem:[%s2590_s7 + $0xe0] sm:$0xf]  ;;  %v1710_v22 = vld [vmem:[%s2590_s7 + $0xe4] sm:$0xf0] }
  0x4b   :  { %784 = vmatpush.bf16.msra.mxu3 %v1448_v35  ;;  %v1405_v35 = vld [vmem:[%s2588_s5 + $0x98] sm:$0xf0]  ;;  %v1572_v24 = vor.u32 %v1710_v22, %v1571_v21  ;;  %v1699_v21 = vld [vmem:[%s2590_s7 + $0x94] sm:$0xf] }
  0x4c   :  { %746 = vmatpush.bf16.msra.mxu0 %v1372_v34  ;;  %v1667_v34 = vld [vmem:[%s2588_s5 + $0x94] sm:$0xf]  ;;  %v1533_v22 = vld [vmem:[%s2590_s7 + $0x98] sm:$0xf0] }
  0x4d   :  { %772 = vmatpush.bf16.msra.mxu2 %v1376_v39 }
  0x4e   :  { %759 = vmatpush.bf16.msra.mxu1 %v1436_v47  ;;  %v1515_v47 = vld [vmem:[%s2590_s7 + $0x70] sm:$0xf] }
  0x4f   :  { %785 = vmatpush.bf16.msra.mxu3 %v1440_v48  ;;  %v1696_v48 = vld [vmem:[%s2590_s7 + $0x74] sm:$0xf0] }
  0x50   :  { %747 = vmatpush.bf16.msra.mxu0 %v1364_v50  ;;  %v1408_v50 = vor.u32 %v1667_v34, %v1405_v35  ;;  %v1516_v56 = vor.u32 %v1696_v48, %v1515_v47  ;;  %v1563_v34 = vld [vmem:[%s2590_s7 + $0xd0] sm:$0xf]  ;;  %v1708_v35 = vld [vmem:[%s2590_s7 + $0xd4] sm:$0xf0]  ;;  %v1555_v47 = vld [vmem:[%s2590_s7 + $0xc0] sm:$0xf] }
  0x51   :  { %773 = vmatpush.bf16.msra.mxu2 %v1368_v54  ;;  %v1706_v48 = vld [vmem:[%s2590_s7 + $0xc4] sm:$0xf0] }
  0x52   :  { %760 = vmatpush.bf16.msra.mxu1 %v1428_v60 }
  0x53   :  { %786 = vmatpush.bf16.msra.mxu3 %v1432_v61  ;;  %v1507_v61 = vld [vmem:[%s2590_s7 + $0x60] sm:$0xf] }
  0x54   :  { %748 = vmatpush.bf16.msra.mxu0 %v1356_v63  ;;  %v1693_v63 = vld [vmem:[%s2590_s7 + $0x64] sm:$0xf]  ;;  %v1508_v0 = vor.u32 %v1694_v62, %v1507_v61  ;;  %v1703_v61 = vld [vmem:[%s2590_s7 + $0xb4] sm:$0xf] }
  0x55   :  { %774 = vmatpush.bf16.msra.mxu2 %v1360_v4  ;;  %v1512_v4 = vor.u32 %v1693_v63, %v1509_v1  ;;  %v1549_v63 = vld [vmem:[%s2590_s7 + $0xb8] sm:$0xf0]  ;;  %v1467_v1 = vld [vmem:[%s2590_s7 + $0x10] sm:$0xf] }
  0x56   :  { %761 = vmatpush.bf16.msra.mxu1 %v1420_v11  ;;  %v1711_v11 = vld [vmem:[%s2590_s7 + $0xf4] sm:$0xf] }
  0x57   :  { %787 = vmatpush.bf16.msra.mxu3 %v1424_v12  ;;  %v1581_v12 = vld [vmem:[%s2590_s7 + $0xf8] sm:$0xf0] }
  0x58   :  { %749 = vmatpush.bf16.msra.mxu0 %v1348_v15  ;;  %v1499_v15 = vld [vmem:[%s2590_s7 + $0x50] sm:$0xf] }
  0x59   :  { %775 = vmatpush.bf16.msra.mxu2 %v1352_v20  ;;  %v1500_v18 = vor.u32 %v1692_v16, %v1499_v15  ;;  %v1681_v15 = vld [vmem:[%s2590_s7 + $0x4] sm:$0xf]  ;;  %v1461_v16 = vld [vmem:[%s2590_s7 + $0x8] sm:$0xf0] }
  0x5a   :  { %762 = vmatpush.bf16.msra.mxu1 %v1412_v26 }
  0x5b   :  { %788 = vmatpush.bf16.msra.mxu3 %v1416_v27  ;;  %v1491_v27 = vld [vmem:[%s2590_s7 + $0x40] sm:$0xf] }
  0x5c   :  { %750 = vmatpush.bf16.msra.mxu0 %v1340_v32  ;;  %v1493_v32 = vld [vmem:[%s2590_s7 + $0x48] sm:$0xf0] }
  0x5d   :  { %776 = vmatpush.bf16.msra.mxu2 %v1344_v40 }
  0x5e   :  { %763 = vmatpush.bf16.msra.mxu1 %v1404_v49  ;;  %v1705_v49 = vld [vmem:[%s2590_s7 + $0xc4] sm:$0xf] }
  0x5f   :  { %789 = vmatpush.bf16.msra.mxu3 %v1408_v50  ;;  %v1556_v50 = vor.u32 %v1706_v48, %v1555_v47 }
  0x60   :  { %751 = vmatpush.bf16.msra.mxu0 %v1332_v51  ;;  %v1557_v51 = vld [vmem:[%s2590_s7 + $0xc8] sm:$0xf0] }
  0x61   :  { %777 = vmatpush.bf16.msra.mxu2 %v1336_v55  ;;  %v1560_v52 = vor.u32 %v1705_v49, %v1557_v51  ;;  %v1685_v55 = vld [vmem:[%s2590_s7 + $0x24] sm:$0xf] }
  0xa0   :  { %v245_v3 = vpop.f32.mrf.mxu0 }
  0xa1   :  { %v246_v7 = vadd.f32 %v245_v3, %v72_v57  ;;  %v258_v8 = vpop.f32.mrf.mxu1  ;;  %v1666_v3 = vld [vmem:[%s2588_s5 + $0x84] sm:$0xf0] }
  0xa2   :  { %v1396_v5 = vor.u32 %v1666_v3, %v1395_v2  ;;  %v1684_v2 = vld [vmem:[%s2590_s7 + $0x14] sm:$0xf0]  ;;  %v1683_v3 = vld [vmem:[%s2590_s7 + $0x14] sm:$0xf] }
  0xa3   :  { %v259_v14 = vadd.f32 %v258_v8, %v246_v7  ;;  %v1397_v7 = vld [vmem:[%s2588_s5 + $0x88] sm:$0xf0]  ;;  %v1579_v8 = vld [vmem:[%s2590_s7 + $0xf0] sm:$0xf] }
  0xa4   :  { %v1400_v9 = vor.u32 %v1665_v6, %v1397_v7  ;;  %764 = vmatpush.bf16.msra.mxu1 %v1396_v5  ;;  %v1580_v13 = vor.u32 %v1712_v10, %v1579_v8  ;;  %v1469_v5 = vld [vmem:[%s2590_s7 + $0x18] sm:$0xf0]  ;;  %v1539_v6 = vld [vmem:[%s2590_s7 + $0xa0] sm:$0xf]  ;;  %v1702_v7 = vld [vmem:[%s2590_s7 + $0xa4] sm:$0xf0] }
  0xa5   :  { %v288_v23 = vmax.f32 %v259_v14, 0.0  ;;  %v1584_v14 = vor.u32 %v1711_v11, %v1581_v12  ;;  %v1472_v8 = vor.u32 %v1683_v3, %v1469_v5  ;;  %v1701_v10 = vld [vmem:[%s2590_s7 + $0xa4] sm:$0xf]  ;;  %v1541_v11 = vld [vmem:[%s2590_s7 + $0xa8] sm:$0xf0] }
  0xa6   :  { %790 = vmatpush.bf16.msra.mxu3 %v1400_v9  ;;  %v1540_v9 = vor.u32 %v1702_v7, %v1539_v6  ;;  %v1459_v12 = vld [vmem:[%s2590_s7] sm:$0xf] }
  0xa7   :  { %v290_v29 = vpack.c.bf16 %v288_v23, %v288_v23  ;;  %v1709_v23 = vld [vmem:[%s2590_s7 + $0xe4] sm:$0xf]  ;;  %v832_v5 = vld [vmem:[%s2593_s8] sm:$0x3] }
  0xa8   :  { %v284_v38 = vpop.f32.mrf.mxu3  ;;  %v247_v39 = vpop.f32.mrf.mxu0  ;;  %v1576_v26 = vor.u32 %v1709_v23, %v1573_v25  ;;  %v324_v25 = vld [vmem:[%s2591_s4] sm:$0x3] }
  0xa9   :  { %v271_v30 = vpop.f32.mrf.mxu2  ;;  %v260_v43 = vpop.f32.mrf.mxu1  ;;  %498 = vmatmul.bf16.vlgmr.msrb.gmra.mxu0 %v290_v29  ;;  %524 = vmatmul.bf16.vlgmr.msrb.gmra.mxu2 %v290_v29  ;;  %v1689_v29 = vld [vmem:[%s2590_s7 + $0x44] sm:$0xf]  ;;  %v1565_v39 = vld [vmem:[%s2590_s7 + $0xd8] sm:$0xf0] }
  0xaa   :  { %v272_v37 = vadd.f32 %v271_v30, %v73_v19  ;;  %998 = vmatpush.bf16.msrb.mxu0 %v1516_v56  ;;  %1024 = vmatpush.bf16.msrb.mxu2 %v1520_v58  ;;  %v1501_v19 = vld [vmem:[%s2590_s7 + $0x58] sm:$0xf0]  ;;  %v1492_v30 = vor.u32 %v1690_v28, %v1491_v27  ;;  %v1496_v33 = vor.u32 %v1689_v29, %v1493_v32  ;;  %v1687_v43 = vld [vmem:[%s2590_s7 + $0x34] sm:$0xf]  ;;  %v1698_v27 = vld [vmem:[%s2590_s7 + $0x84] sm:$0xf0] }
  0xab   :  { %v1504_v20 = vor.u32 %v1691_v17, %v1501_v19  ;;  %v1531_v19 = vld [vmem:[%s2590_s7 + $0x90] sm:$0xf]  ;;  %v1697_v28 = vld [vmem:[%s2590_s7 + $0x84] sm:$0xf]  ;;  %v326_v32 = vperm.slane %v324_v25, 0 }
  0xac   :  { %v285_v45 = vadd.f32 %v284_v38, %v272_v37  ;;  %v1564_v37 = vor.u32 %v1708_v35, %v1563_v34  ;;  %v1707_v38 = vld [vmem:[%s2590_s7 + $0xd4] sm:$0xf] }
  0xad   :  { %v1568_v40 = vor.u32 %v1707_v38, %v1565_v39 }
  0xae   :  { %v289_v54 = vmax.f32 %v285_v45, 0.0  ;;  %999 = vmatpush.bf16.msrb.mxu0 %v1508_v0  ;;  %1025 = vmatpush.bf16.msrb.mxu2 %v1512_v4  ;;  %v1485_v45 = vld [vmem:[%s2590_s7 + $0x38] sm:$0xf0]  ;;  %v1552_v0 = vor.u32 %v1703_v61, %v1549_v63  ;;  %v1468_v4 = vor.u32 %v1684_v2, %v1467_v1 }
  0xaf   :  { %v1488_v46 = vor.u32 %v1687_v43, %v1485_v45 }
  0xb0   :  { %v291_v57 = vpack.c.bf16 %v289_v54, %v289_v54  ;;  %v286_v60 = vpop.f32.mrf.mxu3  ;;  %v1686_v54 = vld [vmem:[%s2590_s7 + $0x24] sm:$0xf0] }
  0xb1   :  { %v273_v59 = vpop.f32.mrf.mxu2  ;;  %v1476_v56 = vor.u32 %v1686_v54, %v1475_v53  ;;  %v1704_v60 = vld [vmem:[%s2590_s7 + $0xb4] sm:$0xf0] }
  0xb2   :  { %511 = vmatmul.bf16.vlgmr.msrb.gmra.mxu1 %v291_v57  ;;  %537 = vmatmul.bf16.vlgmr.msrb.gmra.mxu3 %v291_v57  ;;  %v1477_v57 = vld [vmem:[%s2590_s7 + $0x28] sm:$0xf0]  ;;  %v1547_v59 = vld [vmem:[%s2590_s7 + $0xb0] sm:$0xf] }
  0xb3   :  { %1011 = vmatpush.bf16.msrb.mxu1 %v1580_v13  ;;  %1037 = vmatpush.bf16.msrb.mxu3 %v1584_v14  ;;  %v1480_v58 = vor.u32 %v1685_v55, %v1477_v57  ;;  %v1548_v62 = vor.u32 %v1704_v60, %v1547_v59  ;;  %v1544_v13 = vor.u32 %v1701_v10, %v1541_v11  ;;  %v1682_v14 = vld [vmem:[%s2590_s7 + $0x4] sm:$0xf0] }
  0xb4   :  { %1000 = vmatpush.bf16.msrb.mxu0 %v1500_v18  ;;  %1026 = vmatpush.bf16.msrb.mxu2 %v1504_v20  ;;  %v1460_v17 = vor.u32 %v1682_v14, %v1459_v12  ;;  %v1464_v18 = vor.u32 %v1681_v15, %v1461_v16  ;;  %v1700_v20 = vld [vmem:[%s2590_s7 + $0x94] sm:$0xf0] }
  0xb5   :  { %v1532_v23 = vor.u32 %v1700_v20, %v1531_v19  ;;  %v835_v19 = vperm.slane %v832_v5, 1 }
  0xb7   :  { %1012 = vmatpush.bf16.msrb.mxu1 %v1572_v24  ;;  %1038 = vmatpush.bf16.msrb.mxu3 %v1576_v26  ;;  %v1536_v24 = vor.u32 %v1699_v21, %v1533_v22  ;;  %v1523_v26 = vld [vmem:[%s2590_s7 + $0x80] sm:$0xf] }
  0xb8   :  { %1001 = vmatpush.bf16.msrb.mxu0 %v1492_v30  ;;  %1027 = vmatpush.bf16.msrb.mxu2 %v1496_v33  ;;  %v1524_v29 = vor.u32 %v1698_v27, %v1523_v26  ;;  %v1525_v30 = vld [vmem:[%s2590_s7 + $0x88] sm:$0xf0] }
  0xb9   :  { %v1528_v34 = vor.u32 %v1697_v28, %v1525_v30 }
  0xbb   :  { %1013 = vmatpush.bf16.msrb.mxu1 %v1564_v37  ;;  %1039 = vmatpush.bf16.msrb.mxu3 %v1568_v40  ;;  %v327_v37 = vperm.slane %v324_v25, 1 }
  0xbc   :  { %1002 = vmatpush.bf16.msrb.mxu0 %v1484_v44  ;;  %1028 = vmatpush.bf16.msrb.mxu2 %v1488_v46 }
  0xbf   :  { %1014 = vmatpush.bf16.msrb.mxu1 %v1556_v50  ;;  %1040 = vmatpush.bf16.msrb.mxu3 %v1560_v52  ;;  %v578_v52 = vld [vmem:[%s2592_s6] sm:$0x3] }
  0xc0   :  { %1003 = vmatpush.bf16.msrb.mxu0 %v1476_v56  ;;  %1029 = vmatpush.bf16.msrb.mxu2 %v1480_v58  ;;  %v580_v54 = vperm.slane %v578_v52, 0  ;;  %v581_v59 = vperm.slane %v578_v52, 1 }
  0xc3   :  { %1015 = vmatpush.bf16.msrb.mxu1 %v1548_v62  ;;  %1041 = vmatpush.bf16.msrb.mxu3 %v1552_v0 }
  0xc4   :  { %1004 = vmatpush.bf16.msrb.mxu0 %v1468_v4  ;;  %1030 = vmatpush.bf16.msrb.mxu2 %v1472_v8 }
  0xc7   :  { %1016 = vmatpush.bf16.msrb.mxu1 %v1540_v9  ;;  %1042 = vmatpush.bf16.msrb.mxu3 %v1544_v13  ;;  %v834_v9 = vperm.slane %v832_v5, 0 }
  0xc8   :  { %1005 = vmatpush.bf16.msrb.mxu0 %v1460_v17  ;;  %1031 = vmatpush.bf16.msrb.mxu2 %v1464_v18 }
  0xcb   :  { %1017 = vmatpush.bf16.msrb.mxu1 %v1532_v23  ;;  %1043 = vmatpush.bf16.msrb.mxu3 %v1536_v24 }
  0xcf   :  { %1018 = vmatpush.bf16.msrb.mxu1 %v1524_v29  ;;  %1044 = vmatpush.bf16.msrb.mxu3 %v1528_v34 }
 0x126   :  { %v499_v33 = vpop.f32.mrf.mxu0 }
 0x127   :  { %v500_v35 = vadd.f32 %v499_v33, %v326_v32 }
 0x12c   :  { %v525_v38 = vpop.f32.mrf.mxu2 }
 0x12d   :  { %v526_v43 = vadd.f32 %v525_v38, %v327_v37 }
 0x12e   :  { %v501_v41 = vpop.f32.mrf.mxu0 }
 0x12f   :  { %v512_v39 = vpop.f32.mrf.mxu1 }
 0x130   :  { %v513_v40 = vadd.f32 %v512_v39, %v500_v35 }
 0x132   :  { %v542_v42 = vmax.f32 %v513_v40, 0.0 }
 0x134   :  { %v544_v44 = vpack.c.bf16 %v542_v42, %v542_v42  ;;  %v527_v47 = vpop.f32.mrf.mxu2 }
 0x135   :  { %v538_v45 = vpop.f32.mrf.mxu3 }
 0x136   :  { %v539_v46 = vadd.f32 %v538_v45, %v526_v43  ;;  %752 = vmatmul.bf16.vlgmr.msra.gmra.mxu0 %v544_v44  ;;  %778 = vmatmul.bf16.vlgmr.msra.gmra.mxu2 %v544_v44 }
 0x137   :  { %v514_v48 = vpop.f32.mrf.mxu1 }
 0x138   :  { %v543_v49 = vmax.f32 %v539_v46, 0.0 }
 0x13a   :  { %v545_v50 = vpack.c.bf16 %v543_v49, %v543_v49 }
 0x13c   :  { %765 = vmatmul.bf16.vlgmr.msra.gmra.mxu1 %v545_v50  ;;  %791 = vmatmul.bf16.vlgmr.msra.gmra.mxu3 %v545_v50 }
 0x13d   :  { %v540_v51 = vpop.f32.mrf.mxu3 }
 0x146   :  { %1006 = vmatmul.bf16.vlgmr.msrb.gmra.mxu0 %v544_v44  ;;  %1032 = vmatmul.bf16.vlgmr.msrb.gmra.mxu2 %v544_v44 }
 0x14c   :  { %1019 = vmatmul.bf16.vlgmr.msrb.gmra.mxu1 %v545_v50  ;;  %1045 = vmatmul.bf16.vlgmr.msrb.gmra.mxu3 %v545_v50 }
 0x1b3   :  { %v753_v53 = vpop.f32.mrf.mxu0 }
 0x1b4   :  { %v754_v55 = vadd.f32 %v753_v53, %v580_v54 }
 0x1b9   :  { %v766_v56 = vpop.f32.mrf.mxu1  ;;  %v779_v57 = vpop.f32.mrf.mxu2 }
 0x1ba   :  { %v767_v58 = vadd.f32 %v766_v56, %v754_v55  ;;  %v780_v61 = vadd.f32 %v779_v57, %v581_v59 }
 0x1bb   :  { %v755_v60 = vpop.f32.mrf.mxu0 }
 0x1bc   :  { %1713 = vtanh.f32 %v767_v58 }
 0x1bf   :  { %v792_v62 = vpop.f32.mrf.mxu3 }
 0x1c0   :  { %v793_v63 = vadd.f32 %v792_v62, %v780_v61 }
 0x1c1   :  { %v768_v0 = vpop.f32.mrf.mxu1  ;;  %v781_v1 = vpop.f32.mrf.mxu2 }
 0x1c2   :  { %v1714_v2 = vpop.eup %1713  ;;  %1715 = vtanh.f32 %v793_v63 }
 0x1c3   :  { %v1007_v3 = vpop.f32.mrf.mxu0  ;;  %v798_v4 = vmul.f32 0.5, %v1714_v2 }
 0x1c4   :  { %v1008_v16 = vadd.f32 %v1007_v3, %v834_v9 }
 0x1c5   :  { %v1050_v6 = vmul.f32 1.442695, %v798_v4 }
 0x1c7   :  { %v794_v7 = vpop.f32.mrf.mxu3  ;;  %1717 = vpow2.f32 %v1050_v6 }
 0x1c8   :  { %v1716_v8 = vpop.eup %1715 }
 0x1c9   :  { %v1020_v10 = vpop.f32.mrf.mxu1  ;;  %v1033_v11 = vpop.f32.mrf.mxu2  ;;  %v799_v12 = vmul.f32 0.5, %v1716_v8 }
 0x1ca   :  { %v1021_v18 = vadd.f32 %v1020_v10, %v1008_v16  ;;  %v1034_v25 = vadd.f32 %v1033_v11, %v835_v19 }
 0x1cb   :  { %v1009_v13 = vpop.f32.mrf.mxu0  ;;  %v1052_v14 = vmul.f32 1.442695, %v799_v12  ;;  %v1060_v15 = vadd.f32 %v799_v12, %v798_v4 }
 0x1cd   :  { %v1718_v17 = vpop.eup %1717  ;;  %1719 = vpow2.f32 %v1052_v14  ;;  %1061 = vadd.xlane.f32.xlu0 %v1060_v15 }
 0x1ce   :  { %v1054_v20 = vmul.f32 %v1718_v17, %v1977_v31 }
 0x1cf   :  { %v1046_v21 = vpop.f32.mrf.mxu3 }
 0x1d0   :  { %v1056_v22 = vadd.f32 %v1054_v20, %v1021_v18  ;;  %v1047_v27 = vadd.f32 %v1046_v21, %v1034_v25 }
 0x1d1   :  { %v1022_v23 = vpop.f32.mrf.mxu1  ;;  %v1035_v24 = vpop.f32.mrf.mxu2 }
 0x1d2   :  { %1058 = vst [vmem:[%s2594_s9] sm:$0xff] %v1056_v22 }
 0x1d3   :  { %v1720_v26 = vpop.eup %1719 }
 0x1d4   :  { %v1055_v28 = vmul.f32 %v1720_v26, %v1988_v36 }
 0x1d6   :  { %v1057_v29 = vadd.f32 %v1055_v28, %v1047_v27 }
 0x1d7   :  { %v1048_v30 = vpop.f32.mrf.mxu3 }
 0x1d8   :  { %1059 = vst [vmem:[%s2594_s9 + $0x8] sm:$0xff] %v1057_v29 }
 0x240   :  { %v1062_v31 = vpop.xlane.xlu0 %1061 }
 0x241   :  { %1064 = vst.msk [vmem:[%s2595_s10] sm:$0xff] %vm1063_vm0, %v1062_v31 }

</bundles_post_ra>
